<compile_context>
chip_gen: v6e
topology: v6e:2x2x1
jax: 0.10.0
libtpu: 0.0.40
codegen_flags: <defaults>
</compile_context>

<pallas_src>
import functools
import math

import jax
import jax.numpy as jnp
from jax import lax
from jax.experimental import pallas as pl
from jax.experimental.pallas import tpu as pltpu

LN_EPS = 1e-6


# ----------------------------- tiling helpers ----------------------------- #

def _round_up(x, m):
    return (x + m - 1) // m * m


def _row_tiling(m, target=512):
    """Row tiling for (B*S)-row kernels: returns (tile, padded_row_count).

    Rows are padded up to a tile multiple instead of falling back to tiny divisor
    tiles; target=512 sits near the HBM-roofline knee on v5e/v6e and within v7x VMEM.
    """
    if m <= target:
        tm = _round_up(m, 8)
        return tm, tm
    return target, _round_up(m, target)


def _seq_tile(s, target, step):
    """Largest multiple of `step` <= target that divides s, else full s."""
    if s <= target:
        return s
    for t in range(target, step - 1, -step):
        if s % t == 0:
            return t
    return s


def _col_tile(n, target=2048):
    """d_ff tile: multiple of 128 dividing n (else full n)."""
    if n <= target:
        return n
    for t in range(target, 0, -128):
        if n % t == 0:
            return t
    return n


def _cparams(semantics, vmem_est_bytes):
    # vmem limit derived from actual block/scratch bytes with 2x headroom,
    # capped at 64 MiB (v7x physical VMEM), floored at 8 MiB.
    limit = int(min(max(2 * vmem_est_bytes, 8 * 1024 * 1024), 64 * 1024 * 1024))
    return pltpu.CompilerParams(dimension_semantics=semantics, vmem_limit_bytes=limit)


def _pad_rows(x2d, mp):
    m = x2d.shape[0]
    if mp == m:
        return x2d
    return jnp.pad(x2d, ((0, mp - m), (0, 0)))


# ----------------------------- in-kernel helpers ----------------------------- #

def _layernorm(x, g, b):
    # Annotated-transformer LayerNorm: a_2 * (x - mean) / (std + eps) + b_2
    # (torch .std() is unbiased -> divide by N-1); eps added to std, not var.
    d = x.shape[-1]
    mean = jnp.mean(x, axis=-1, keepdims=True)
    var = jnp.sum((x - mean) ** 2, axis=-1, keepdims=True) * (1.0 / (d - 1))
    return g * (x - mean) / (jnp.sqrt(var) + LN_EPS) + b


# ----------------------------- Pallas kernels ----------------------------- #

def _embed_kernel(x_ref, w_ref, o_ref):
    # (TM, Fin) @ (Fin, D)   (no bias)
    o_ref[...] = jnp.dot(x_ref[...].astype(jnp.bfloat16), w_ref[...],
                         preferred_element_type=jnp.float32)


def _ln_qkv_kernel(x_ref, g_ref, b_ref, w_ref, bqkv_ref, q_ref, k_ref, v_ref):
    # Fused pre-norm + single fused QKV projection: one (TM, D) @ (D, 3D) MXU pass.
    # The 1/sqrt(Dh) score scale is already folded into the Q columns of w_ref/bqkv_ref.
    xn = _layernorm(x_ref[...], g_ref[...], b_ref[...]).astype(jnp.bfloat16)
    qkv = jnp.dot(xn, w_ref[...], preferred_element_type=jnp.float32) + bqkv_ref[...]
    D = q_ref.shape[-1]
    q_ref[...] = qkv[:, :D].astype(jnp.bfloat16)
    k_ref[...] = qkv[:, D:2 * D].astype(jnp.bfloat16)
    v_ref[...] = qkv[:, 2 * D:].astype(jnp.bfloat16)


def _attn_kernel(mb_ref, q_ref, k_ref, v_ref, h_ref, wo_ref, bo_ref, o_ref,
                 m_ref, l_ref, acc_ref, *, num_heads):
    # Flash-style attention over kv tiles for one (batch, query-tile), fused with the
    # output projection and residual add.  Heads split with static lane slices; the
    # accumulator is one (TQ, D) f32 buffer (heads in contiguous lane groups) and m/l
    # are one (TQ, H) buffer.  q is pre-scaled (scale folded into Wq).  mb is an
    # additive mask bias (0 keep / -1e9 masked).
    kv = pl.program_id(2)
    nkv = pl.num_programs(2)

    @pl.when(kv == 0)
    def _():
        m_ref[...] = jnp.full(m_ref.shape, -jnp.inf, m_ref.dtype)
        l_ref[...] = jnp.zeros(l_ref.shape, l_ref.dtype)
        acc_ref[...] = jnp.zeros(acc_ref.shape, acc_ref.dtype)

    q = q_ref[0]            # (TQ, D)  bf16 (pre-scaled)
    k = k_ref[0]            # (TKV, D) bf16
    v = v_ref[0]            # (TKV, D) bf16
    bias = mb_ref[0]        # (1, TKV) f32 additive mask bias

    D = q.shape[-1]
    H = num_heads
    Dh = D // H

    # TODO(synk): for Dh >= 128 switch this static unroll to lax.fori_loop with pl.ds
    #             lane slices to bound vreg live ranges at large H.
    for hh in range(H):
        lo = hh * Dh
        # scores_h = qh @ kh.T  (contract Dh without an explicit transpose)
        s = lax.dot_general(q[:, lo:lo + Dh], k[:, lo:lo + Dh],
                            (((1,), (1,)), ((), ())),
                            preferred_element_type=jnp.float32)           # (TQ, TKV)
        s = s + bias

        m_prev = m_ref[:, hh:hh + 1]                                      # (TQ, 1)
        m_new = jnp.maximum(m_prev, jnp.max(s, axis=-1, keepdims=True))
        alpha = jnp.exp(m_prev - m_new)
        p = jnp.exp(s - m_new)                                            # (TQ, TKV)
        l_ref[:, hh:hh + 1] = alpha * l_ref[:, hh:hh + 1] + jnp.sum(
            p, axis=-1, keepdims=True)
        acc_ref[:, lo:lo + Dh] = alpha * acc_ref[:, lo:lo + Dh] + jnp.dot(
            p.astype(jnp.bfloat16), v[:, lo:lo + Dh],
            preferred_element_type=jnp.float32)
        m_ref[:, hh:hh + 1] = m_new

    @pl.when(kv == nkv - 1)
    def _():
        # Normalize all heads in the single (TQ, D) accumulator, then ONE full-K
        # (TQ, D) @ (D, D) matmul with Wo + residual + bias.
        inv_l = pl.reciprocal(l_ref[...], approx=True)                    # (TQ, H)
        for hh in range(H):
            lo = hh * Dh
            acc_ref[:, lo:lo + Dh] = acc_ref[:, lo:lo + Dh] * inv_l[:, hh:hh + 1]
        attn = acc_ref[...].astype(jnp.bfloat16)                          # (TQ, D)
        o_ref[0] = h_ref[0] + bo_ref[...] + jnp.dot(
            attn, wo_ref[...], preferred_element_type=jnp.float32)


def _ln_ffn_kernel(x_ref, g_ref, b_ref, w1_ref, b1_ref, w2_ref, b2_ref, o_ref,
                   xn_ref, acc_ref):
    # Fused pre-norm + PositionwiseFeedForward + residual add, with the d_ff axis tiled
    # over grid axis 1: only (D, TDff) / (TDff, D) weight slices and a (tm, TDff)
    # intermediate are resident; the (tm, D) f32 accumulator and the cached LayerNorm
    # output live in scratch.
    j = pl.program_id(1)

    @pl.when(j == 0)
    def _():
        xn_ref[...] = _layernorm(x_ref[...], g_ref[...], b_ref[...]).astype(jnp.bfloat16)
        acc_ref[...] = jnp.zeros(acc_ref.shape, acc_ref.dtype)

    h1 = jnp.dot(xn_ref[...], w1_ref[...], preferred_element_type=jnp.float32) + b1_ref[...]
    h1 = jnp.maximum(h1, 0.0).astype(jnp.bfloat16)
    acc_ref[...] += jnp.dot(h1, w2_ref[...], preferred_element_type=jnp.float32)

    @pl.when(j == pl.num_programs(1) - 1)
    def _():
        o_ref[...] = x_ref[...] + acc_ref[...] + b2_ref[...]


def _ln_out_kernel(x_ref, g_ref, b_ref, w_ref, bo_ref, o_ref):
    # Fused final encoder LayerNorm + output projection (lane-dense padded width).
    xn = _layernorm(x_ref[...], g_ref[...], b_ref[...]).astype(jnp.bfloat16)
    o_ref[...] = jnp.dot(xn, w_ref[...], preferred_element_type=jnp.float32) + bo_ref[...]


# ----------------------------- pallas_call wrappers ----------------------------- #

def embed_linear(x2d, w):
    M, Fin = x2d.shape
    D = w.shape[1]
    tm, Mp = _row_tiling(M)
    xp = _pad_rows(x2d, Mp)
    est = 2 * (tm * Fin * 4 + Fin * D * 2 + tm * D * 4)
    out = pl.pallas_call(
        _embed_kernel,
        out_shape=jax.ShapeDtypeStruct((Mp, D), jnp.float32),
        grid=(Mp // tm,),
        in_specs=[pl.BlockSpec((tm, Fin), lambda i: (i, 0)),
                  pl.BlockSpec((Fin, D), lambda i: (0, 0))],
        out_specs=pl.BlockSpec((tm, D), lambda i: (i, 0)),
        compiler_params=_cparams(("parallel",), est),
    )(xp, w)
    return out if Mp == M else out[:M]


def ln_qkv(x2d, g, b, w_qkv, b_qkv):
    M, D = x2d.shape
    tm, Mp = _row_tiling(M)
    xp = _pad_rows(x2d, Mp)
    row_in = pl.BlockSpec((tm, D), lambda i: (i, 0))
    row_out = pl.BlockSpec((tm, D), lambda i: (i, 0))
    vec = pl.BlockSpec((1, D), lambda i: (0, 0))
    out_sd = jax.ShapeDtypeStruct((Mp, D), jnp.bfloat16)
    est = 2 * (tm * D * 4 + 2 * D * 4 + D * 3 * D * 2 + 3 * D * 4 + 3 * tm * D * 2)
    q, k, v = pl.pallas_call(
        _ln_qkv_kernel,
        out_shape=(out_sd, out_sd, out_sd),
        grid=(Mp // tm,),
        in_specs=[row_in, vec, vec,
                  pl.BlockSpec((D, 3 * D), lambda i: (0, 0)),
                  pl.BlockSpec((1, 3 * D), lambda i: (0, 0))],
        out_specs=(row_out, row_out, row_out),
        compiler_params=_cparams(("parallel",), est),
    )(xp, g, b, w_qkv, b_qkv)
    if Mp != M:
        q, k, v = q[:M], k[:M], v[:M]
    return q, k, v


def attention_block(mask_bias, q, k, v, h, wo, bo, num_heads):
    B, S, D = q.shape
    tq = _seq_tile(S, 256, 8)      # query tile (bounds VMEM; extra parallel axis)
    tkv = _seq_tile(S, 512, 128)   # kv tile (flash online-softmax axis)
    nq, nkv = S // tq, S // tkv
    kernel = functools.partial(_attn_kernel, num_heads=num_heads)
    blocks = (tkv * 4 + tq * D * 2 + 2 * tkv * D * 2 + tq * D * 4
              + D * D * 2 + D * 4 + tq * D * 4)
    scratch = tq * D * 4 + 2 * tq * 128 * 4
    return pl.pallas_call(
        kernel,
        out_shape=jax.ShapeDtypeStruct((B, S, D), jnp.float32),
        grid=(B, nq, nkv),
        in_specs=[pl.BlockSpec((1, 1, tkv), lambda b, i, j: (b, 0, j)),   # mask bias
                  pl.BlockSpec((1, tq, D), lambda b, i, j: (b, i, 0)),    # q tile
                  pl.BlockSpec((1, tkv, D), lambda b, i, j: (b, j, 0)),   # k tile
                  pl.BlockSpec((1, tkv, D), lambda b, i, j: (b, j, 0)),   # v tile
                  pl.BlockSpec((1, tq, D), lambda b, i, j: (b, i, 0)),    # residual h
                  pl.BlockSpec((D, D), lambda b, i, j: (0, 0)),           # wo (resident)
                  pl.BlockSpec((1, D), lambda b, i, j: (0, 0))],          # bo
        out_specs=pl.BlockSpec((1, tq, D), lambda b, i, j: (b, i, 0)),
        scratch_shapes=[pltpu.VMEM((tq, num_heads), jnp.float32),   # m  (TQ, H)
                        pltpu.VMEM((tq, num_heads), jnp.float32),   # l  (TQ, H)
                        pltpu.VMEM((tq, D), jnp.float32)],          # acc (TQ, D)
        input_output_aliases={4: 0},   # accumulate residual into h's buffer in place
        compiler_params=_cparams(("parallel", "parallel", "arbitrary"),
                                 2 * blocks + scratch),
    )(mask_bias, q, k, v, h, wo, bo)


def ln_ffn(x2d, g, b, w1, b1, w2, b2):
    M, D = x2d.shape
    Dff = w1.shape[1]
    tm, Mp = _row_tiling(M)
    tdff = _col_tile(Dff)
    xp = _pad_rows(x2d, Mp)
    blocks = (tm * D * 4 + 2 * D * 4 + D * tdff * 2 + tdff * 4
              + tdff * D * 2 + D * 4 + tm * D * 4)
    scratch = tm * D * 2 + tm * D * 4
    out = pl.pallas_call(
        _ln_ffn_kernel,
        out_shape=jax.ShapeDtypeStruct((Mp, D), jnp.float32),
        grid=(Mp // tm, Dff // tdff),
        in_specs=[pl.BlockSpec((tm, D), lambda i, j: (i, 0)),
                  pl.BlockSpec((1, D), lambda i, j: (0, 0)),
                  pl.BlockSpec((1, D), lambda i, j: (0, 0)),
                  pl.BlockSpec((D, tdff), lambda i, j: (0, j)),
                  pl.BlockSpec((1, tdff), lambda i, j: (0, j)),
                  pl.BlockSpec((tdff, D), lambda i, j: (j, 0)),
                  pl.BlockSpec((1, D), lambda i, j: (0, 0))],
        out_specs=pl.BlockSpec((tm, D), lambda i, j: (i, 0)),
        scratch_shapes=[pltpu.VMEM((tm, D), jnp.bfloat16),   # cached LayerNorm(x)
                        pltpu.VMEM((tm, D), jnp.float32)],   # d_ff accumulator
        input_output_aliases={0: 0},   # residual accumulated in place
        compiler_params=_cparams(("parallel", "arbitrary"), 2 * blocks + scratch),
    )(xp, g, b, w1, b1, w2, b2)
    return out if Mp == M else out[:M]


def ln_out(x2d, g, b, w, bo):
    M, D = x2d.shape
    Dout = w.shape[1]
    tm, Mp = _row_tiling(M)
    xp = _pad_rows(x2d, Mp)
    est = 2 * (tm * D * 4 + 2 * D * 4 + D * Dout * 2 + Dout * 4 + tm * Dout * 4)
    out = pl.pallas_call(
        _ln_out_kernel,
        out_shape=jax.ShapeDtypeStruct((Mp, Dout), jnp.float32),
        grid=(Mp // tm,),
        in_specs=[pl.BlockSpec((tm, D), lambda i: (i, 0)),
                  pl.BlockSpec((1, D), lambda i: (0, 0)),
                  pl.BlockSpec((1, D), lambda i: (0, 0)),
                  pl.BlockSpec((D, Dout), lambda i: (0, 0)),
                  pl.BlockSpec((1, Dout), lambda i: (0, 0))],
        out_specs=pl.BlockSpec((tm, Dout), lambda i: (i, 0)),
        compiler_params=_cparams(("parallel",), est),
    )(xp, g, b, w, bo)
    return out if Mp == M else out[:M]


# ----------------------------- model ----------------------------- #

def init_params(key, d_model, d_ff, num_heads, num_layers, in_features, out_features):
    keys = list(jax.random.split(key, 8 + 16 * num_layers))
    ki = iter(keys)

    def lin_w(din, dout):
        bound = 1.0 / math.sqrt(din)
        return jax.random.uniform(next(ki), (din, dout), jnp.float32, -bound, bound)

    def lin_b(din, dout):
        bound = 1.0 / math.sqrt(din)
        return jax.random.uniform(next(ki), (1, dout), jnp.float32, -bound, bound)

    params = {}
    params['lin_emb_w'] = lin_w(in_features, d_model).astype(jnp.bfloat16)

    # final output projection padded to a lane-dense (multiple of 128) width
    ow = lin_w(d_model, out_features)
    ob = lin_b(d_model, out_features)
    pad = (-out_features) % 128
    params['out_w'] = jnp.pad(ow, ((0, 0), (0, pad))).astype(jnp.bfloat16)
    params['out_b'] = jnp.pad(ob, ((0, 0), (0, pad)))

    params['enc_ln_g'] = jnp.ones((1, d_model), jnp.float32)
    params['enc_ln_b'] = jnp.zeros((1, d_model), jnp.float32)

    scale = 1.0 / math.sqrt(d_model // num_heads)
    layers = []
    for _ in range(num_layers):
        lp = {}
        wq, bq = lin_w(d_model, d_model), lin_b(d_model, d_model)
        wk, bk = lin_w(d_model, d_model), lin_b(d_model, d_model)
        wv, bv = lin_w(d_model, d_model), lin_b(d_model, d_model)
        # Fused QKV weight/bias; the 1/sqrt(Dh) softmax scale is folded into the Q
        # columns (mathematically identical to scaling the scores, free at runtime).
        lp['w_qkv'] = jnp.concatenate([wq * scale, wk, wv], axis=1).astype(jnp.bfloat16)
        lp['b_qkv'] = jnp.concatenate([bq * scale, bk, bv], axis=1)
        lp['wo'] = lin_w(d_model, d_model).astype(jnp.bfloat16)
        lp['bo'] = lin_b(d_model, d_model)
        lp['w1'] = lin_w(d_model, d_ff).astype(jnp.bfloat16)
        lp['b1'] = lin_b(d_model, d_ff)
        lp['w2'] = lin_w(d_ff, d_model).astype(jnp.bfloat16)
        lp['b2'] = lin_b(d_ff, d_model)
        lp['ln1_g'] = jnp.ones((1, d_model), jnp.float32)
        lp['ln1_b'] = jnp.zeros((1, d_model), jnp.float32)
        lp['ln2_g'] = jnp.ones((1, d_model), jnp.float32)
        lp['ln2_b'] = jnp.zeros((1, d_model), jnp.float32)
        layers.append(lp)
    params['layers'] = layers
    return params


def transformer_seg_forward(params, x, mask, *, num_heads, out_features):
    # x: (B, S, in_features); mask: (B, S) with 1 = attend, 0 = masked
    B, S, Fin = x.shape
    D = params['lin_emb_w'].shape[1]

    h = embed_linear(x.reshape(B * S, Fin), params['lin_emb_w']).reshape(B, S, D)

    # additive mask bias built once per batch (0 keep, -1e9 masked); reused by all layers
    mask_bias = ((mask.astype(jnp.float32) - 1.0) * 1e9).reshape(B, 1, S)

    for lp in params['layers']:
        # --- sublayer 0: x + self_attn(norm(x))  (dropout = identity) ---
        q, k, v = ln_qkv(h.reshape(B * S, D), lp['ln1_g'], lp['ln1_b'],
                         lp['w_qkv'], lp['b_qkv'])
        h = attention_block(mask_bias,
                            q.reshape(B, S, D), k.reshape(B, S, D), v.reshape(B, S, D),
                            h, lp['wo'], lp['bo'], num_heads)
        # --- sublayer 1: x + ffn(norm(x)) ---
        h = ln_ffn(h.reshape(B * S, D), lp['ln2_g'], lp['ln2_b'],
                   lp['w1'], lp['b1'], lp['w2'], lp['b2']).reshape(B, S, D)

    # TODO(synk): dropout layers (p=0.01) are modeled as identity (inference mode).
    y = ln_out(h.reshape(B * S, D), params['enc_ln_g'], params['enc_ln_b'],
               params['out_w'], params['out_b'])
    return y[:, :out_features].reshape(B, S, out_features)


if __name__ == "__main__":
    # small shapes consistent with the module
    B, S = 2, 8
    in_features, d_model, d_ff = 16, 32, 64
    num_heads, num_layers, out_features = 4, 2, 8

    key = jax.random.PRNGKey(0)
    kx, kp = jax.random.split(key)
    x = jax.random.normal(kx, (B, S, in_features), jnp.float32)
    # mask: batch 0 attends to all positions; batch 1 masks its last two key positions
    mask = jnp.ones((B, S), jnp.float32).at[1, -2:].set(0.0)

    params = init_params(kp, d_model, d_ff, num_heads, num_layers, in_features, out_features)

    fwd = jax.jit(transformer_seg_forward, static_argnames=("num_heads", "out_features"))
    y = fwd(params, x, mask, num_heads=num_heads, out_features=out_features)
    y = jax.block_until_ready(y)

    assert y.shape == (B, S, out_features)
    assert bool(jnp.all(jnp.isfinite(y)))
    print("KERNEL_OK")
</pallas_src>

<mosaic_0001>
module attributes {stable_mosaic.version = 11 : i64} {
  func.func @_ln_qkv_kernel(%arg0: i32, %arg1: memref<16x32xf32, #tpu.memory_space<vmem>>, %arg2: memref<1x32xf32, #tpu.memory_space<vmem>>, %arg3: memref<1x32xf32, #tpu.memory_space<vmem>>, %arg4: memref<32x96xbf16, #tpu.memory_space<vmem>>, %arg5: memref<1x96xf32, #tpu.memory_space<vmem>>, %arg6: memref<16x32xbf16, #tpu.memory_space<vmem>>, %arg7: memref<16x32xbf16, #tpu.memory_space<vmem>>, %arg8: memref<16x32xbf16, #tpu.memory_space<vmem>>) attributes {dimension_semantics = [#tpu.dimension_semantics<parallel>], iteration_bounds = array<i64: 1>, scalar_prefetch = 0 : i64, scratch_operands = 0 : i64, tpu.core_type = #tpu.core_type<tc>, window_params = [{transform_indices = @transform_0, window_bounds = array<i64: 16, 32>}, {pipeline_mode = #tpu.pipeline_mode<synchronous>, transform_indices = @transform_1, window_bounds = array<i64: 1, 32>}, {pipeline_mode = #tpu.pipeline_mode<synchronous>, transform_indices = @transform_2, window_bounds = array<i64: 1, 32>}, {pipeline_mode = #tpu.pipeline_mode<synchronous>, transform_indices = @transform_3, window_bounds = array<i64: 32, 96>}, {pipeline_mode = #tpu.pipeline_mode<synchronous>, transform_indices = @transform_4, window_bounds = array<i64: 1, 96>}, {transform_indices = @transform_5, window_bounds = array<i64: 16, 32>}, {transform_indices = @transform_6, window_bounds = array<i64: 16, 32>}, {transform_indices = @transform_7, window_bounds = array<i64: 16, 32>}]} {
    %c0 = arith.constant 0 : index
    %c0_0 = arith.constant 0 : index
    %0 = vector.load %arg1[%c0, %c0_0] : memref<16x32xf32, #tpu.memory_space<vmem>>, vector<16x32xf32>
    %c0_1 = arith.constant 0 : index
    %c0_2 = arith.constant 0 : index
    %1 = vector.load %arg2[%c0_1, %c0_2] : memref<1x32xf32, #tpu.memory_space<vmem>>, vector<1x32xf32>
    %c0_3 = arith.constant 0 : index
    %c0_4 = arith.constant 0 : index
    %2 = vector.load %arg3[%c0_3, %c0_4] : memref<1x32xf32, #tpu.memory_space<vmem>>, vector<1x32xf32>
    %cst = arith.constant dense<0.000000e+00> : vector<16xf32>
    %3 = vector.multi_reduction <add>, %0, %cst [1] : vector<16x32xf32> to vector<16xf32>
    %4 = vector.shape_cast %3 : vector<16xf32> to vector<16x1xf32>
    %cst_5 = arith.constant 3.200000e+01 : f32
    %5 = vector.broadcast %cst_5 : f32 to vector<16x1xf32>
    %6 = arith.divf %4, %5 : vector<16x1xf32>
    %7 = vector.broadcast %6 : vector<16x1xf32> to vector<16x32xf32>
    %8 = arith.subf %0, %7 : vector<16x32xf32>
    %9 = arith.mulf %8, %8 : vector<16x32xf32>
    %cst_6 = arith.constant dense<0.000000e+00> : vector<16xf32>
    %10 = vector.multi_reduction <add>, %9, %cst_6 [1] : vector<16x32xf32> to vector<16xf32>
    %11 = vector.shape_cast %10 : vector<16xf32> to vector<16x1xf32>
    %cst_7 = arith.constant 0.0322580636 : f32
    %12 = vector.broadcast %cst_7 : f32 to vector<16x1xf32>
    %13 = arith.mulf %11, %12 : vector<16x1xf32>
    %14 = vector.broadcast %6 : vector<16x1xf32> to vector<16x32xf32>
    %15 = arith.subf %0, %14 : vector<16x32xf32>
    %16 = vector.broadcast %1 : vector<1x32xf32> to vector<16x32xf32>
    %17 = arith.mulf %16, %15 : vector<16x32xf32>
    %18 = math.sqrt %13 : vector<16x1xf32>
    %cst_8 = arith.constant 9.99999997E-7 : f32
    %19 = vector.broadcast %cst_8 : f32 to vector<16x1xf32>
    %20 = arith.addf %18, %19 : vector<16x1xf32>
    %21 = vector.broadcast %20 : vector<16x1xf32> to vector<16x32xf32>
    %22 = arith.divf %17, %21 : vector<16x32xf32>
    %23 = vector.broadcast %2 : vector<1x32xf32> to vector<16x32xf32>
    %24 = arith.addf %22, %23 : vector<16x32xf32>
    %25 = arith.truncf %24 : vector<16x32xf32> to vector<16x32xbf16>
    %c0_9 = arith.constant 0 : index
    %c0_10 = arith.constant 0 : index
    %26 = vector.load %arg4[%c0_9, %c0_10] : memref<32x96xbf16, #tpu.memory_space<vmem>>, vector<32x96xbf16>
    %cst_11 = arith.constant dense<0.000000e+00> : vector<16x96xf32>
    %27 = tpu.matmul %25, %26, %cst_11 {dimension_numbers = #tpu.dot_dimension_numbers<[1], [0], [0], [1], [0, 0, 1, 1], [], []>} : vector<16x32xbf16>, vector<32x96xbf16>, vector<16x96xf32> -> vector<16x96xf32>
    %c0_12 = arith.constant 0 : index
    %c0_13 = arith.constant 0 : index
    %28 = vector.load %arg5[%c0_12, %c0_13] : memref<1x96xf32, #tpu.memory_space<vmem>>, vector<1x96xf32>
    %29 = vector.broadcast %28 : vector<1x96xf32> to vector<16x96xf32>
    %30 = arith.addf %27, %29 : vector<16x96xf32>
    %31 = vector.extract_strided_slice %30 {offsets = [0, 0], sizes = [16, 32], strides = [1, 1]} : vector<16x96xf32> to vector<16x32xf32>
    %32 = arith.truncf %31 : vector<16x32xf32> to vector<16x32xbf16>
    %c0_14 = arith.constant 0 : index
    %c0_15 = arith.constant 0 : index
    %33 = vector.load %arg6[%c0_14, %c0_15] : memref<16x32xbf16, #tpu.memory_space<vmem>>, vector<16x32xbf16>
    tpu.vector_store %arg6[%c0_14, %c0_15], %32 {strides = array<i32>} : memref<16x32xbf16, #tpu.memory_space<vmem>>, vector<16x32xbf16>,
    %34 = vector.extract_strided_slice %30 {offsets = [0, 32], sizes = [16, 32], strides = [1, 1]} : vector<16x96xf32> to vector<16x32xf32>
    %35 = arith.truncf %34 : vector<16x32xf32> to vector<16x32xbf16>
    %c0_16 = arith.constant 0 : index
    %c0_17 = arith.constant 0 : index
    %36 = vector.load %arg7[%c0_16, %c0_17] : memref<16x32xbf16, #tpu.memory_space<vmem>>, vector<16x32xbf16>
    tpu.vector_store %arg7[%c0_16, %c0_17], %35 {strides = array<i32>} : memref<16x32xbf16, #tpu.memory_space<vmem>>, vector<16x32xbf16>,
    %37 = vector.extract_strided_slice %30 {offsets = [0, 64], sizes = [16, 32], strides = [1, 1]} : vector<16x96xf32> to vector<16x32xf32>
    %38 = arith.truncf %37 : vector<16x32xf32> to vector<16x32xbf16>
    %c0_18 = arith.constant 0 : index
    %c0_19 = arith.constant 0 : index
    %39 = vector.load %arg8[%c0_18, %c0_19] : memref<16x32xbf16, #tpu.memory_space<vmem>>, vector<16x32xbf16>
    tpu.vector_store %arg8[%c0_18, %c0_19], %38 {strides = array<i32>} : memref<16x32xbf16, #tpu.memory_space<vmem>>, vector<16x32xbf16>,
    return
  }
  func.func @transform_0(%arg0: i32) -> (i32, i32) {
    %c0_i32 = arith.constant 0 : i32
    %c0_i32_0 = arith.constant 0 : i32
    return %arg0, %c0_i32 : i32, i32
  }
  func.func @transform_1(%arg0: i32) -> (i32, i32) {
    %c0_i32 = arith.constant 0 : i32
    %c0_i32_0 = arith.constant 0 : i32
    %c0_i32_1 = arith.constant 0 : i32
    return %c0_i32, %c0_i32_0 : i32, i32
  }
  func.func @transform_2(%arg0: i32) -> (i32, i32) {
    %c0_i32 = arith.constant 0 : i32
    %c0_i32_0 = arith.constant 0 : i32
    %c0_i32_1 = arith.constant 0 : i32
    return %c0_i32, %c0_i32_0 : i32, i32
  }
  func.func @transform_3(%arg0: i32) -> (i32, i32) {
    %c0_i32 = arith.constant 0 : i32
    %c0_i32_0 = arith.constant 0 : i32
    %c0_i32_1 = arith.constant 0 : i32
    return %c0_i32, %c0_i32_0 : i32, i32
  }
  func.func @transform_4(%arg0: i32) -> (i32, i32) {
    %c0_i32 = arith.constant 0 : i32
    %c0_i32_0 = arith.constant 0 : i32
    %c0_i32_1 = arith.constant 0 : i32
    return %c0_i32, %c0_i32_0 : i32, i32
  }
  func.func @transform_5(%arg0: i32) -> (i32, i32) {
    %c0_i32 = arith.constant 0 : i32
    %c0_i32_0 = arith.constant 0 : i32
    return %arg0, %c0_i32 : i32, i32
  }
  func.func @transform_6(%arg0: i32) -> (i32, i32) {
    %c0_i32 = arith.constant 0 : i32
    %c0_i32_0 = arith.constant 0 : i32
    return %arg0, %c0_i32 : i32, i32
  }
  func.func @transform_7(%arg0: i32) -> (i32, i32) {
    %c0_i32 = arith.constant 0 : i32
    %c0_i32_0 = arith.constant 0 : i32
    return %arg0, %c0_i32 : i32, i32
  }
}

module attributes {stable_mosaic.version = 11 : i64} {
  func.func @_embed_kernel(%arg0: i32, %arg1: memref<16x16xf32, #tpu.memory_space<vmem>>, %arg2: memref<16x32xbf16, #tpu.memory_space<vmem>>, %arg3: memref<16x32xf32, #tpu.memory_space<vmem>>) attributes {dimension_semantics = [#tpu.dimension_semantics<parallel>], iteration_bounds = array<i64: 1>, scalar_prefetch = 0 : i64, scratch_operands = 0 : i64, tpu.core_type = #tpu.core_type<tc>, window_params = [{transform_indices = @transform_0, window_bounds = array<i64: 16, 16>}, {pipeline_mode = #tpu.pipeline_mode<synchronous>, transform_indices = @transform_1, window_bounds = array<i64: 16, 32>}, {transform_indices = @transform_2, window_bounds = array<i64: 16, 32>}]} {
    %c0 = arith.constant 0 : index
    %c0_0 = arith.constant 0 : index
    %0 = vector.load %arg1[%c0, %c0_0] : memref<16x16xf32, #tpu.memory_space<vmem>>, vector<16x16xf32>
    %1 = arith.truncf %0 : vector<16x16xf32> to vector<16x16xbf16>
    %c0_1 = arith.constant 0 : index
    %c0_2 = arith.constant 0 : index
    %2 = vector.load %arg2[%c0_1, %c0_2] : memref<16x32xbf16, #tpu.memory_space<vmem>>, vector<16x32xbf16>
    %cst = arith.constant dense<0.000000e+00> : vector<16x32xf32>
    %3 = tpu.matmul %1, %2, %cst {dimension_numbers = #tpu.dot_dimension_numbers<[1], [0], [0], [1], [0, 0, 1, 1], [], []>} : vector<16x16xbf16>, vector<16x32xbf16>, vector<16x32xf32> -> vector<16x32xf32>
    %c0_3 = arith.constant 0 : index
    %c0_4 = arith.constant 0 : index
    %4 = vector.load %arg3[%c0_3, %c0_4] : memref<16x32xf32, #tpu.memory_space<vmem>>, vector<16x32xf32>
    tpu.vector_store %arg3[%c0_3, %c0_4], %3 {strides = array<i32>} : memref<16x32xf32, #tpu.memory_space<vmem>>, vector<16x32xf32>,
    return
  }
  func.func @transform_0(%arg0: i32) -> (i32, i32) {
    %c0_i32 = arith.constant 0 : i32
    %c0_i32_0 = arith.constant 0 : i32
    return %arg0, %c0_i32 : i32, i32
  }
  func.func @transform_1(%arg0: i32) -> (i32, i32) {
    %c0_i32 = arith.constant 0 : i32
    %c0_i32_0 = arith.constant 0 : i32
    %c0_i32_1 = arith.constant 0 : i32
    return %c0_i32, %c0_i32_0 : i32, i32
  }
  func.func @transform_2(%arg0: i32) -> (i32, i32) {
    %c0_i32 = arith.constant 0 : i32
    %c0_i32_0 = arith.constant 0 : i32
    return %arg0, %c0_i32 : i32, i32
  }
}

module attributes {stable_mosaic.version = 11 : i64} {
  func.func @_attn_kernel(%arg0: i32, %arg1: i32, %arg2: i32, %arg3: memref<1x1x8xf32, #tpu.memory_space<vmem>>, %arg4: memref<1x8x32xbf16, #tpu.memory_space<vmem>>, %arg5: memref<1x8x32xbf16, #tpu.memory_space<vmem>>, %arg6: memref<1x8x32xbf16, #tpu.memory_space<vmem>>, %arg7: memref<1x8x32xf32, #tpu.memory_space<vmem>>, %arg8: memref<32x32xbf16, #tpu.memory_space<vmem>>, %arg9: memref<1x32xf32, #tpu.memory_space<vmem>>, %arg10: memref<1x8x32xf32, #tpu.memory_space<vmem>>, %arg11: memref<8x4xf32, #tpu.memory_space<vmem>>, %arg12: memref<8x4xf32, #tpu.memory_space<vmem>>, %arg13: memref<8x32xf32, #tpu.memory_space<vmem>>) attributes {dimension_semantics = [#tpu.dimension_semantics<parallel>, #tpu.dimension_semantics<parallel>, #tpu.dimension_semantics<arbitrary>], iteration_bounds = array<i64: 2, 1, 1>, scalar_prefetch = 0 : i64, scratch_operands = 3 : i64, tpu.core_type = #tpu.core_type<tc>, window_params = [{transform_indices = @transform_0, window_bounds = array<i64: 1, 1, 8>}, {transform_indices = @transform_1, window_bounds = array<i64: 1, 8, 32>}, {transform_indices = @transform_2, window_bounds = array<i64: 1, 8, 32>}, {transform_indices = @transform_3, window_bounds = array<i64: 1, 8, 32>}, {transform_indices = @transform_4, window_bounds = array<i64: 1, 8, 32>}, {pipeline_mode = #tpu.pipeline_mode<synchronous>, transform_indices = @transform_5, window_bounds = array<i64: 32, 32>}, {pipeline_mode = #tpu.pipeline_mode<synchronous>, transform_indices = @transform_6, window_bounds = array<i64: 1, 32>}, {transform_indices = @transform_7, window_bounds = array<i64: 1, 8, 32>}]} {
    %c0_i32 = arith.constant 0 : i32
    %0 = arith.cmpi eq, %arg2, %c0_i32 : i32
    %1 = arith.extui %0 : i1 to i32
    %c0_i32_0 = arith.constant 0 : i32
    %2 = arith.cmpi ne, %1, %c0_i32_0 : i32
    scf.if %2 {
      %cst_71 = arith.constant 0xFF800000 : f32
      %130 = vector.broadcast %cst_71 : f32 to vector<8x4xf32>
      %c0_72 = arith.constant 0 : index
      %c0_73 = arith.constant 0 : index
      %131 = vector.load %arg11[%c0_72, %c0_73] : memref<8x4xf32, #tpu.memory_space<vmem>>, vector<8x4xf32>
      tpu.vector_store %arg11[%c0_72, %c0_73], %130 {strides = array<i32>} : memref<8x4xf32, #tpu.memory_space<vmem>>, vector<8x4xf32>,
      %cst_74 = arith.constant 0.000000e+00 : f32
      %132 = vector.broadcast %cst_74 : f32 to vector<8x4xf32>
      %c0_75 = arith.constant 0 : index
      %c0_76 = arith.constant 0 : index
      %133 = vector.load %arg12[%c0_75, %c0_76] : memref<8x4xf32, #tpu.memory_space<vmem>>, vector<8x4xf32>
      tpu.vector_store %arg12[%c0_75, %c0_76], %132 {strides = array<i32>} : memref<8x4xf32, #tpu.memory_space<vmem>>, vector<8x4xf32>,
      %cst_77 = arith.constant 0.000000e+00 : f32
      %134 = vector.broadcast %cst_77 : f32 to vector<8x32xf32>
      %c0_78 = arith.constant 0 : index
      %c0_79 = arith.constant 0 : index
      %135 = vector.load %arg13[%c0_78, %c0_79] : memref<8x32xf32, #tpu.memory_space<vmem>>, vector<8x32xf32>
      tpu.vector_store %arg13[%c0_78, %c0_79], %134 {strides = array<i32>} : memref<8x32xf32, #tpu.memory_space<vmem>>, vector<8x32xf32>,
    } else {
    }
    %c0 = arith.constant 0 : index
    %c0_1 = arith.constant 0 : index
    %c0_2 = arith.constant 0 : index
    %3 = vector.load %arg4[%c0, %c0_1, %c0_2] : memref<1x8x32xbf16, #tpu.memory_space<vmem>>, vector<1x8x32xbf16>
    %4 = vector.shape_cast %3 : vector<1x8x32xbf16> to vector<8x32xbf16>
    %c0_3 = arith.constant 0 : index
    %c0_4 = arith.constant 0 : index
    %c0_5 = arith.constant 0 : index
    %5 = vector.load %arg5[%c0_3, %c0_4, %c0_5] : memref<1x8x32xbf16, #tpu.memory_space<vmem>>, vector<1x8x32xbf16>
    %6 = vector.shape_cast %5 : vector<1x8x32xbf16> to vector<8x32xbf16>
    %c0_6 = arith.constant 0 : index
    %c0_7 = arith.constant 0 : index
    %c0_8 = arith.constant 0 : index
    %7 = vector.load %arg6[%c0_6, %c0_7, %c0_8] : memref<1x8x32xbf16, #tpu.memory_space<vmem>>, vector<1x8x32xbf16>
    %8 = vector.shape_cast %7 : vector<1x8x32xbf16> to vector<8x32xbf16>
    %c0_9 = arith.constant 0 : index
    %c0_10 = arith.constant 0 : index
    %c0_11 = arith.constant 0 : index
    %9 = vector.load %arg3[%c0_9, %c0_10, %c0_11] : memref<1x1x8xf32, #tpu.memory_space<vmem>>, vector<1x1x8xf32>
    %10 = vector.shape_cast %9 : vector<1x1x8xf32> to vector<1x8xf32>
    %11 = vector.extract_strided_slice %4 {offsets = [0, 0], sizes = [8, 8], strides = [1, 1]} : vector<8x32xbf16> to vector<8x8xbf16>
    %12 = vector.extract_strided_slice %6 {offsets = [0, 0], sizes = [8, 8], strides = [1, 1]} : vector<8x32xbf16> to vector<8x8xbf16>
    %cst = arith.constant dense<0.000000e+00> : vector<8x8xf32>
    %13 = tpu.matmul %11, %12, %cst {dimension_numbers = #tpu.dot_dimension_numbers<[1], [1], [0], [0], [0, 0, 1, 0], [], []>} : vector<8x8xbf16>, vector<8x8xbf16>, vector<8x8xf32> -> vector<8x8xf32>
    %14 = vector.broadcast %10 : vector<1x8xf32> to vector<8x8xf32>
    %15 = arith.addf %13, %14 : vector<8x8xf32>
    %c0_12 = arith.constant 0 : index
    %c0_13 = arith.constant 0 : index
    %16 = vector.load %arg11[%c0_12, %c0_13] : memref<8x4xf32, #tpu.memory_space<vmem>>, vector<8x1xf32>
    %cst_14 = arith.constant dense<0xFF800000> : vector<8xf32>
    %17 = vector.multi_reduction <maximumf>, %15, %cst_14 [1] : vector<8x8xf32> to vector<8xf32>
    %18 = vector.shape_cast %17 : vector<8xf32> to vector<8x1xf32>
    %19 = arith.maximumf %16, %18 : vector<8x1xf32>
    %20 = arith.subf %16, %19 : vector<8x1xf32>
    %21 = math.exp %20 : vector<8x1xf32>
    %22 = vector.broadcast %19 : vector<8x1xf32> to vector<8x8xf32>
    %23 = arith.subf %15, %22 : vector<8x8xf32>
    %24 = math.exp %23 : vector<8x8xf32>
    %c0_15 = arith.constant 0 : index
    %c0_16 = arith.constant 0 : index
    %25 = vector.load %arg12[%c0_15, %c0_16] : memref<8x4xf32, #tpu.memory_space<vmem>>, vector<8x1xf32>
    %26 = arith.mulf %21, %25 : vector<8x1xf32>
    %cst_17 = arith.constant dense<0.000000e+00> : vector<8xf32>
    %27 = vector.multi_reduction <add>, %24, %cst_17 [1] : vector<8x8xf32> to vector<8xf32>
    %28 = vector.shape_cast %27 : vector<8xf32> to vector<8x1xf32>
    %29 = arith.addf %26, %28 : vector<8x1xf32>
    %c0_18 = arith.constant 0 : index
    %c0_19 = arith.constant 0 : index
    %30 = vector.load %arg12[%c0_18, %c0_19] : memref<8x4xf32, #tpu.memory_space<vmem>>, vector<8x1xf32>
    tpu.vector_store %arg12[%c0_18, %c0_19], %29 {strides = array<i32>} : memref<8x4xf32, #tpu.memory_space<vmem>>, vector<8x1xf32>,
    %c0_20 = arith.constant 0 : index
    %c0_21 = arith.constant 0 : index
    %31 = vector.load %arg13[%c0_20, %c0_21] : memref<8x32xf32, #tpu.memory_space<vmem>>, vector<8x8xf32>
    %32 = vector.broadcast %21 : vector<8x1xf32> to vector<8x8xf32>
    %33 = arith.mulf %32, %31 : vector<8x8xf32>
    %34 = arith.truncf %24 : vector<8x8xf32> to vector<8x8xbf16>
    %35 = vector.extract_strided_slice %8 {offsets = [0, 0], sizes = [8, 8], strides = [1, 1]} : vector<8x32xbf16> to vector<8x8xbf16>
    %cst_22 = arith.constant dense<0.000000e+00> : vector<8x8xf32>
    %36 = tpu.matmul %34, %35, %cst_22 {dimension_numbers = #tpu.dot_dimension_numbers<[1], [0], [0], [1], [0, 0, 1, 1], [], []>} : vector<8x8xbf16>, vector<8x8xbf16>, vector<8x8xf32> -> vector<8x8xf32>
    %37 = arith.addf %33, %36 : vector<8x8xf32>
    %c0_23 = arith.constant 0 : index
    %c0_24 = arith.constant 0 : index
    %38 = vector.load %arg13[%c0_23, %c0_24] : memref<8x32xf32, #tpu.memory_space<vmem>>, vector<8x8xf32>
    tpu.vector_store %arg13[%c0_23, %c0_24], %37 {strides = array<i32>} : memref<8x32xf32, #tpu.memory_space<vmem>>, vector<8x8xf32>,
    %c0_25 = arith.constant 0 : index
    %c0_26 = arith.constant 0 : index
    %39 = vector.load %arg11[%c0_25, %c0_26] : memref<8x4xf32, #tpu.memory_space<vmem>>, vector<8x1xf32>
    tpu.vector_store %arg11[%c0_25, %c0_26], %19 {strides = array<i32>} : memref<8x4xf32, #tpu.memory_space<vmem>>, vector<8x1xf32>,
    %40 = vector.extract_strided_slice %4 {offsets = [0, 8], sizes = [8, 8], strides = [1, 1]} : vector<8x32xbf16> to vector<8x8xbf16>
    %41 = vector.extract_strided_slice %6 {offsets = [0, 8], sizes = [8, 8], strides = [1, 1]} : vector<8x32xbf16> to vector<8x8xbf16>
    %cst_27 = arith.constant dense<0.000000e+00> : vector<8x8xf32>
    %42 = tpu.matmul %40, %41, %cst_27 {dimension_numbers = #tpu.dot_dimension_numbers<[1], [1], [0], [0], [0, 0, 1, 0], [], []>} : vector<8x8xbf16>, vector<8x8xbf16>, vector<8x8xf32> -> vector<8x8xf32>
    %43 = vector.broadcast %10 : vector<1x8xf32> to vector<8x8xf32>
    %44 = arith.addf %42, %43 : vector<8x8xf32>
    %c0_28 = arith.constant 0 : index
    %c1 = arith.constant 1 : index
    %45 = vector.load %arg11[%c0_28, %c1] : memref<8x4xf32, #tpu.memory_space<vmem>>, vector<8x1xf32>
    %cst_29 = arith.constant dense<0xFF800000> : vector<8xf32>
    %46 = vector.multi_reduction <maximumf>, %44, %cst_29 [1] : vector<8x8xf32> to vector<8xf32>
    %47 = vector.shape_cast %46 : vector<8xf32> to vector<8x1xf32>
    %48 = arith.maximumf %45, %47 : vector<8x1xf32>
    %49 = arith.subf %45, %48 : vector<8x1xf32>
    %50 = math.exp %49 : vector<8x1xf32>
    %51 = vector.broadcast %48 : vector<8x1xf32> to vector<8x8xf32>
    %52 = arith.subf %44, %51 : vector<8x8xf32>
    %53 = math.exp %52 : vector<8x8xf32>
    %c0_30 = arith.constant 0 : index
    %c1_31 = arith.constant 1 : index
    %54 = vector.load %arg12[%c0_30, %c1_31] : memref<8x4xf32, #tpu.memory_space<vmem>>, vector<8x1xf32>
    %55 = arith.mulf %50, %54 : vector<8x1xf32>
    %cst_32 = arith.constant dense<0.000000e+00> : vector<8xf32>
    %56 = vector.multi_reduction <add>, %53, %cst_32 [1] : vector<8x8xf32> to vector<8xf32>
    %57 = vector.shape_cast %56 : vector<8xf32> to vector<8x1xf32>
    %58 = arith.addf %55, %57 : vector<8x1xf32>
    %c0_33 = arith.constant 0 : index
    %c1_34 = arith.constant 1 : index
    %59 = vector.load %arg12[%c0_33, %c1_34] : memref<8x4xf32, #tpu.memory_space<vmem>>, vector<8x1xf32>
    tpu.vector_store %arg12[%c0_33, %c1_34], %58 {strides = array<i32>} : memref<8x4xf32, #tpu.memory_space<vmem>>, vector<8x1xf32>,
    %c0_35 = arith.constant 0 : index
    %c8 = arith.constant 8 : index
    %60 = vector.load %arg13[%c0_35, %c8] : memref<8x32xf32, #tpu.memory_space<vmem>>, vector<8x8xf32>
    %61 = vector.broadcast %50 : vector<8x1xf32> to vector<8x8xf32>
    %62 = arith.mulf %61, %60 : vector<8x8xf32>
    %63 = arith.truncf %53 : vector<8x8xf32> to vector<8x8xbf16>
    %64 = vector.extract_strided_slice %8 {offsets = [0, 8], sizes = [8, 8], strides = [1, 1]} : vector<8x32xbf16> to vector<8x8xbf16>
    %cst_36 = arith.constant dense<0.000000e+00> : vector<8x8xf32>
    %65 = tpu.matmul %63, %64, %cst_36 {dimension_numbers = #tpu.dot_dimension_numbers<[1], [0], [0], [1], [0, 0, 1, 1], [], []>} : vector<8x8xbf16>, vector<8x8xbf16>, vector<8x8xf32> -> vector<8x8xf32>
    %66 = arith.addf %62, %65 : vector<8x8xf32>
    %c0_37 = arith.constant 0 : index
    %c8_38 = arith.constant 8 : index
    %67 = vector.load %arg13[%c0_37, %c8_38] : memref<8x32xf32, #tpu.memory_space<vmem>>, vector<8x8xf32>
    tpu.vector_store %arg13[%c0_37, %c8_38], %66 {strides = array<i32>} : memref<8x32xf32, #tpu.memory_space<vmem>>, vector<8x8xf32>,
    %c0_39 = arith.constant 0 : index
    %c1_40 = arith.constant 1 : index
    %68 = vector.load %arg11[%c0_39, %c1_40] : memref<8x4xf32, #tpu.memory_space<vmem>>, vector<8x1xf32>
    tpu.vector_store %arg11[%c0_39, %c1_40], %48 {strides = array<i32>} : memref<8x4xf32, #tpu.memory_space<vmem>>, vector<8x1xf32>,
    %69 = vector.extract_strided_slice %4 {offsets = [0, 16], sizes = [8, 8], strides = [1, 1]} : vector<8x32xbf16> to vector<8x8xbf16>
    %70 = vector.extract_strided_slice %6 {offsets = [0, 16], sizes = [8, 8], strides = [1, 1]} : vector<8x32xbf16> to vector<8x8xbf16>
    %cst_41 = arith.constant dense<0.000000e+00> : vector<8x8xf32>
    %71 = tpu.matmul %69, %70, %cst_41 {dimension_numbers = #tpu.dot_dimension_numbers<[1], [1], [0], [0], [0, 0, 1, 0], [], []>} : vector<8x8xbf16>, vector<8x8xbf16>, vector<8x8xf32> -> vector<8x8xf32>
    %72 = vector.broadcast %10 : vector<1x8xf32> to vector<8x8xf32>
    %73 = arith.addf %71, %72 : vector<8x8xf32>
    %c0_42 = arith.constant 0 : index
    %c2 = arith.constant 2 : index
    %74 = vector.load %arg11[%c0_42, %c2] : memref<8x4xf32, #tpu.memory_space<vmem>>, vector<8x1xf32>
    %cst_43 = arith.constant dense<0xFF800000> : vector<8xf32>
    %75 = vector.multi_reduction <maximumf>, %73, %cst_43 [1] : vector<8x8xf32> to vector<8xf32>
    %76 = vector.shape_cast %75 : vector<8xf32> to vector<8x1xf32>
    %77 = arith.maximumf %74, %76 : vector<8x1xf32>
    %78 = arith.subf %74, %77 : vector<8x1xf32>
    %79 = math.exp %78 : vector<8x1xf32>
    %80 = vector.broadcast %77 : vector<8x1xf32> to vector<8x8xf32>
    %81 = arith.subf %73, %80 : vector<8x8xf32>
    %82 = math.exp %81 : vector<8x8xf32>
    %c0_44 = arith.constant 0 : index
    %c2_45 = arith.constant 2 : index
    %83 = vector.load %arg12[%c0_44, %c2_45] : memref<8x4xf32, #tpu.memory_space<vmem>>, vector<8x1xf32>
    %84 = arith.mulf %79, %83 : vector<8x1xf32>
    %cst_46 = arith.constant dense<0.000000e+00> : vector<8xf32>
    %85 = vector.multi_reduction <add>, %82, %cst_46 [1] : vector<8x8xf32> to vector<8xf32>
    %86 = vector.shape_cast %85 : vector<8xf32> to vector<8x1xf32>
    %87 = arith.addf %84, %86 : vector<8x1xf32>
    %c0_47 = arith.constant 0 : index
    %c2_48 = arith.constant 2 : index
    %88 = vector.load %arg12[%c0_47, %c2_48] : memref<8x4xf32, #tpu.memory_space<vmem>>, vector<8x1xf32>
    tpu.vector_store %arg12[%c0_47, %c2_48], %87 {strides = array<i32>} : memref<8x4xf32, #tpu.memory_space<vmem>>, vector<8x1xf32>,
    %c0_49 = arith.constant 0 : index
    %c16 = arith.constant 16 : index
    %89 = vector.load %arg13[%c0_49, %c16] : memref<8x32xf32, #tpu.memory_space<vmem>>, vector<8x8xf32>
    %90 = vector.broadcast %79 : vector<8x1xf32> to vector<8x8xf32>
    %91 = arith.mulf %90, %89 : vector<8x8xf32>
    %92 = arith.truncf %82 : vector<8x8xf32> to vector<8x8xbf16>
    %93 = vector.extract_strided_slice %8 {offsets = [0, 16], sizes = [8, 8], strides = [1, 1]} : vector<8x32xbf16> to vector<8x8xbf16>
    %cst_50 = arith.constant dense<0.000000e+00> : vector<8x8xf32>
    %94 = tpu.matmul %92, %93, %cst_50 {dimension_numbers = #tpu.dot_dimension_numbers<[1], [0], [0], [1], [0, 0, 1, 1], [], []>} : vector<8x8xbf16>, vector<8x8xbf16>, vector<8x8xf32> -> vector<8x8xf32>
    %95 = arith.addf %91, %94 : vector<8x8xf32>
    %c0_51 = arith.constant 0 : index
    %c16_52 = arith.constant 16 : index
    %96 = vector.load %arg13[%c0_51, %c16_52] : memref<8x32xf32, #tpu.memory_space<vmem>>, vector<8x8xf32>
    tpu.vector_store %arg13[%c0_51, %c16_52], %95 {strides = array<i32>} : memref<8x32xf32, #tpu.memory_space<vmem>>, vector<8x8xf32>,
    %c0_53 = arith.constant 0 : index
    %c2_54 = arith.constant 2 : index
    %97 = vector.load %arg11[%c0_53, %c2_54] : memref<8x4xf32, #tpu.memory_space<vmem>>, vector<8x1xf32>
    tpu.vector_store %arg11[%c0_53, %c2_54], %77 {strides = array<i32>} : memref<8x4xf32, #tpu.memory_space<vmem>>, vector<8x1xf32>,
    %98 = vector.extract_strided_slice %4 {offsets = [0, 24], sizes = [8, 8], strides = [1, 1]} : vector<8x32xbf16> to vector<8x8xbf16>
    %99 = vector.extract_strided_slice %6 {offsets = [0, 24], sizes = [8, 8], strides = [1, 1]} : vector<8x32xbf16> to vector<8x8xbf16>
    %cst_55 = arith.constant dense<0.000000e+00> : vector<8x8xf32>
    %100 = tpu.matmul %98, %99, %cst_55 {dimension_numbers = #tpu.dot_dimension_numbers<[1], [1], [0], [0], [0, 0, 1, 0], [], []>} : vector<8x8xbf16>, vector<8x8xbf16>, vector<8x8xf32> -> vector<8x8xf32>
    %101 = vector.broadcast %10 : vector<1x8xf32> to vector<8x8xf32>
    %102 = arith.addf %100, %101 : vector<8x8xf32>
    %c0_56 = arith.constant 0 : index
    %c3 = arith.constant 3 : index
    %103 = vector.load %arg11[%c0_56, %c3] : memref<8x4xf32, #tpu.memory_space<vmem>>, vector<8x1xf32>
    %cst_57 = arith.constant dense<0xFF800000> : vector<8xf32>
    %104 = vector.multi_reduction <maximumf>, %102, %cst_57 [1] : vector<8x8xf32> to vector<8xf32>
    %105 = vector.shape_cast %104 : vector<8xf32> to vector<8x1xf32>
    %106 = arith.maximumf %103, %105 : vector<8x1xf32>
    %107 = arith.subf %103, %106 : vector<8x1xf32>
    %108 = math.exp %107 : vector<8x1xf32>
    %109 = vector.broadcast %106 : vector<8x1xf32> to vector<8x8xf32>
    %110 = arith.subf %102, %109 : vector<8x8xf32>
    %111 = math.exp %110 : vector<8x8xf32>
    %c0_58 = arith.constant 0 : index
    %c3_59 = arith.constant 3 : index
    %112 = vector.load %arg12[%c0_58, %c3_59] : memref<8x4xf32, #tpu.memory_space<vmem>>, vector<8x1xf32>
    %113 = arith.mulf %108, %112 : vector<8x1xf32>
    %cst_60 = arith.constant dense<0.000000e+00> : vector<8xf32>
    %114 = vector.multi_reduction <add>, %111, %cst_60 [1] : vector<8x8xf32> to vector<8xf32>
    %115 = vector.shape_cast %114 : vector<8xf32> to vector<8x1xf32>
    %116 = arith.addf %113, %115 : vector<8x1xf32>
    %c0_61 = arith.constant 0 : index
    %c3_62 = arith.constant 3 : index
    %117 = vector.load %arg12[%c0_61, %c3_62] : memref<8x4xf32, #tpu.memory_space<vmem>>, vector<8x1xf32>
    tpu.vector_store %arg12[%c0_61, %c3_62], %116 {strides = array<i32>} : memref<8x4xf32, #tpu.memory_space<vmem>>, vector<8x1xf32>,
    %c0_63 = arith.constant 0 : index
    %c24 = arith.constant 24 : index
    %118 = vector.load %arg13[%c0_63, %c24] : memref<8x32xf32, #tpu.memory_space<vmem>>, vector<8x8xf32>
    %119 = vector.broadcast %108 : vector<8x1xf32> to vector<8x8xf32>
    %120 = arith.mulf %119, %118 : vector<8x8xf32>
    %121 = arith.truncf %111 : vector<8x8xf32> to vector<8x8xbf16>
    %122 = vector.extract_strided_slice %8 {offsets = [0, 24], sizes = [8, 8], strides = [1, 1]} : vector<8x32xbf16> to vector<8x8xbf16>
    %cst_64 = arith.constant dense<0.000000e+00> : vector<8x8xf32>
    %123 = tpu.matmul %121, %122, %cst_64 {dimension_numbers = #tpu.dot_dimension_numbers<[1], [0], [0], [1], [0, 0, 1, 1], [], []>} : vector<8x8xbf16>, vector<8x8xbf16>, vector<8x8xf32> -> vector<8x8xf32>
    %124 = arith.addf %120, %123 : vector<8x8xf32>
    %c0_65 = arith.constant 0 : index
    %c24_66 = arith.constant 24 : index
    %125 = vector.load %arg13[%c0_65, %c24_66] : memref<8x32xf32, #tpu.memory_space<vmem>>, vector<8x8xf32>
    tpu.vector_store %arg13[%c0_65, %c24_66], %124 {strides = array<i32>} : memref<8x32xf32, #tpu.memory_space<vmem>>, vector<8x8xf32>,
    %c0_67 = arith.constant 0 : index
    %c3_68 = arith.constant 3 : index
    %126 = vector.load %arg11[%c0_67, %c3_68] : memref<8x4xf32, #tpu.memory_space<vmem>>, vector<8x1xf32>
    tpu.vector_store %arg11[%c0_67, %c3_68], %106 {strides = array<i32>} : memref<8x4xf32, #tpu.memory_space<vmem>>, vector<8x1xf32>,
    %c0_i32_69 = arith.constant 0 : i32
    %127 = arith.cmpi eq, %arg2, %c0_i32_69 : i32
    %128 = arith.extui %127 : i1 to i32
    %c0_i32_70 = arith.constant 0 : i32
    %129 = arith.cmpi ne, %128, %c0_i32_70 : i32
    scf.if %129 {
      %c0_71 = arith.constant 0 : index
      %c0_72 = arith.constant 0 : index
      %130 = vector.load %arg12[%c0_71, %c0_72] : memref<8x4xf32, #tpu.memory_space<vmem>>, vector<8x4xf32>
      %131 = tpu.reciprocal %130 {approx = true} : vector<8x4xf32> -> vector<8x4xf32>
      %c0_73 = arith.constant 0 : index
      %c0_74 = arith.constant 0 : index
      %132 = vector.load %arg13[%c0_73, %c0_74] : memref<8x32xf32, #tpu.memory_space<vmem>>, vector<8x8xf32>
      %133 = vector.extract_strided_slice %131 {offsets = [0, 0], sizes = [8, 1], strides = [1, 1]} : vector<8x4xf32> to vector<8x1xf32>
      %134 = vector.broadcast %133 : vector<8x1xf32> to vector<8x8xf32>
      %135 = arith.mulf %132, %134 : vector<8x8xf32>
      %c0_75 = arith.constant 0 : index
      %c0_76 = arith.constant 0 : index
      %136 = vector.load %arg13[%c0_75, %c0_76] : memref<8x32xf32, #tpu.memory_space<vmem>>, vector<8x8xf32>
      tpu.vector_store %arg13[%c0_75, %c0_76], %135 {strides = array<i32>} : memref<8x32xf32, #tpu.memory_space<vmem>>, vector<8x8xf32>,
      %c0_77 = arith.constant 0 : index
      %c8_78 = arith.constant 8 : index
      %137 = vector.load %arg13[%c0_77, %c8_78] : memref<8x32xf32, #tpu.memory_space<vmem>>, vector<8x8xf32>
      %138 = vector.extract_strided_slice %131 {offsets = [0, 1], sizes = [8, 1], strides = [1, 1]} : vector<8x4xf32> to vector<8x1xf32>
      %139 = vector.broadcast %138 : vector<8x1xf32> to vector<8x8xf32>
      %140 = arith.mulf %137, %139 : vector<8x8xf32>
      %c0_79 = arith.constant 0 : index
      %c8_80 = arith.constant 8 : index
      %141 = vector.load %arg13[%c0_79, %c8_80] : memref<8x32xf32, #tpu.memory_space<vmem>>, vector<8x8xf32>
      tpu.vector_store %arg13[%c0_79, %c8_80], %140 {strides = array<i32>} : memref<8x32xf32, #tpu.memory_space<vmem>>, vector<8x8xf32>,
      %c0_81 = arith.constant 0 : index
      %c16_82 = arith.constant 16 : index
      %142 = vector.load %arg13[%c0_81, %c16_82] : memref<8x32xf32, #tpu.memory_space<vmem>>, vector<8x8xf32>
      %143 = vector.extract_strided_slice %131 {offsets = [0, 2], sizes = [8, 1], strides = [1, 1]} : vector<8x4xf32> to vector<8x1xf32>
      %144 = vector.broadcast %143 : vector<8x1xf32> to vector<8x8xf32>
      %145 = arith.mulf %142, %144 : vector<8x8xf32>
      %c0_83 = arith.constant 0 : index
      %c16_84 = arith.constant 16 : index
      %146 = vector.load %arg13[%c0_83, %c16_84] : memref<8x32xf32, #tpu.memory_space<vmem>>, vector<8x8xf32>
      tpu.vector_store %arg13[%c0_83, %c16_84], %145 {strides = array<i32>} : memref<8x32xf32, #tpu.memory_space<vmem>>, vector<8x8xf32>,
      %c0_85 = arith.constant 0 : index
      %c24_86 = arith.constant 24 : index
      %147 = vector.load %arg13[%c0_85, %c24_86] : memref<8x32xf32, #tpu.memory_space<vmem>>, vector<8x8xf32>
      %148 = vector.extract_strided_slice %131 {offsets = [0, 3], sizes = [8, 1], strides = [1, 1]} : vector<8x4xf32> to vector<8x1xf32>
      %149 = vector.broadcast %148 : vector<8x1xf32> to vector<8x8xf32>
      %150 = arith.mulf %147, %149 : vector<8x8xf32>
      %c0_87 = arith.constant 0 : index
      %c24_88 = arith.constant 24 : index
      %151 = vector.load %arg13[%c0_87, %c24_88] : memref<8x32xf32, #tpu.memory_space<vmem>>, vector<8x8xf32>
      tpu.vector_store %arg13[%c0_87, %c24_88], %150 {strides = array<i32>} : memref<8x32xf32, #tpu.memory_space<vmem>>, vector<8x8xf32>,
      %c0_89 = arith.constant 0 : index
      %c0_90 = arith.constant 0 : index
      %152 = vector.load %arg13[%c0_89, %c0_90] : memref<8x32xf32, #tpu.memory_space<vmem>>, vector<8x32xf32>
      %153 = arith.truncf %152 : vector<8x32xf32> to vector<8x32xbf16>
      %c0_91 = arith.constant 0 : index
      %c0_92 = arith.constant 0 : index
      %c0_93 = arith.constant 0 : index
      %154 = vector.load %arg7[%c0_91, %c0_92, %c0_93] : memref<1x8x32xf32, #tpu.memory_space<vmem>>, vector<1x8x32xf32>
      %155 = vector.shape_cast %154 : vector<1x8x32xf32> to vector<8x32xf32>
      %c0_94 = arith.constant 0 : index
      %c0_95 = arith.constant 0 : index
      %156 = vector.load %arg9[%c0_94, %c0_95] : memref<1x32xf32, #tpu.memory_space<vmem>>, vector<1x32xf32>
      %157 = vector.broadcast %156 : vector<1x32xf32> to vector<8x32xf32>
      %158 = arith.addf %155, %157 : vector<8x32xf32>
      %c0_96 = arith.constant 0 : index
      %c0_97 = arith.constant 0 : index
      %159 = vector.load %arg8[%c0_96, %c0_97] : memref<32x32xbf16, #tpu.memory_space<vmem>>, vector<32x32xbf16>
      %cst_98 = arith.constant dense<0.000000e+00> : vector<8x32xf32>
      %160 = tpu.matmul %153, %159, %cst_98 {dimension_numbers = #tpu.dot_dimension_numbers<[1], [0], [0], [1], [0, 0, 1, 1], [], []>} : vector<8x32xbf16>, vector<32x32xbf16>, vector<8x32xf32> -> vector<8x32xf32>
      %161 = arith.addf %158, %160 : vector<8x32xf32>
      %c0_99 = arith.constant 0 : index
      %c0_100 = arith.constant 0 : index
      %c0_101 = arith.constant 0 : index
      %162 = vector.load %arg10[%c0_99, %c0_100, %c0_101] : memref<1x8x32xf32, #tpu.memory_space<vmem>>, vector<1x8x32xf32>
      %163 = vector.shape_cast %162 : vector<1x8x32xf32> to vector<8x32xf32>
      %164 = vector.shape_cast %161 : vector<8x32xf32> to vector<1x8x32xf32>
      tpu.vector_store %arg10[%c0_99, %c0_100, %c0_101], %164 {strides = array<i32>} : memref<1x8x32xf32, #tpu.memory_space<vmem>>, vector<1x8x32xf32>,
    } else {
    }
    return
  }
  func.func @transform_0(%arg0: i32, %arg1: i32, %arg2: i32) -> (i32, i32, i32) {
    %c0_i32 = arith.constant 0 : i32
    %c0_i32_0 = arith.constant 0 : i32
    return %arg0, %c0_i32, %arg2 : i32, i32, i32
  }
  func.func @transform_1(%arg0: i32, %arg1: i32, %arg2: i32) -> (i32, i32, i32) {
    %c0_i32 = arith.constant 0 : i32
    %c0_i32_0 = arith.constant 0 : i32
    return %arg0, %arg1, %c0_i32 : i32, i32, i32
  }
  func.func @transform_2(%arg0: i32, %arg1: i32, %arg2: i32) -> (i32, i32, i32) {
    %c0_i32 = arith.constant 0 : i32
    %c0_i32_0 = arith.constant 0 : i32
    return %arg0, %arg2, %c0_i32 : i32, i32, i32
  }
  func.func @transform_3(%arg0: i32, %arg1: i32, %arg2: i32) -> (i32, i32, i32) {
    %c0_i32 = arith.constant 0 : i32
    %c0_i32_0 = arith.constant 0 : i32
    return %arg0, %arg2, %c0_i32 : i32, i32, i32
  }
  func.func @transform_4(%arg0: i32, %arg1: i32, %arg2: i32) -> (i32, i32, i32) {
    %c0_i32 = arith.constant 0 : i32
    %c0_i32_0 = arith.constant 0 : i32
    return %arg0, %arg1, %c0_i32 : i32, i32, i32
  }
  func.func @transform_5(%arg0: i32, %arg1: i32, %arg2: i32) -> (i32, i32) {
    %c0_i32 = arith.constant 0 : i32
    %c0_i32_0 = arith.constant 0 : i32
    %c0_i32_1 = arith.constant 0 : i32
    return %c0_i32, %c0_i32_0 : i32, i32
  }
  func.func @transform_6(%arg0: i32, %arg1: i32, %arg2: i32) -> (i32, i32) {
    %c0_i32 = arith.constant 0 : i32
    %c0_i32_0 = arith.constant 0 : i32
    %c0_i32_1 = arith.constant 0 : i32
    return %c0_i32, %c0_i32_0 : i32, i32
  }
  func.func @transform_7(%arg0: i32, %arg1: i32, %arg2: i32) -> (i32, i32, i32) {
    %c0_i32 = arith.constant 0 : i32
    %c0_i32_0 = arith.constant 0 : i32
    return %arg0, %arg1, %c0_i32 : i32, i32, i32
  }
}

module attributes {stable_mosaic.version = 11 : i64} {
  func.func @_ln_ffn_kernel(%arg0: i32, %arg1: i32, %arg2: memref<16x32xf32, #tpu.memory_space<vmem>>, %arg3: memref<1x32xf32, #tpu.memory_space<vmem>>, %arg4: memref<1x32xf32, #tpu.memory_space<vmem>>, %arg5: memref<32x64xbf16, #tpu.memory_space<vmem>>, %arg6: memref<1x64xf32, #tpu.memory_space<vmem>>, %arg7: memref<64x32xbf16, #tpu.memory_space<vmem>>, %arg8: memref<1x32xf32, #tpu.memory_space<vmem>>, %arg9: memref<16x32xf32, #tpu.memory_space<vmem>>, %arg10: memref<16x32xbf16, #tpu.memory_space<vmem>>, %arg11: memref<16x32xf32, #tpu.memory_space<vmem>>) attributes {dimension_semantics = [#tpu.dimension_semantics<parallel>, #tpu.dimension_semantics<arbitrary>], iteration_bounds = array<i64: 1, 1>, scalar_prefetch = 0 : i64, scratch_operands = 2 : i64, tpu.core_type = #tpu.core_type<tc>, window_params = [{transform_indices = @transform_0, window_bounds = array<i64: 16, 32>}, {pipeline_mode = #tpu.pipeline_mode<synchronous>, transform_indices = @transform_1, window_bounds = array<i64: 1, 32>}, {pipeline_mode = #tpu.pipeline_mode<synchronous>, transform_indices = @transform_2, window_bounds = array<i64: 1, 32>}, {transform_indices = @transform_3, window_bounds = array<i64: 32, 64>}, {transform_indices = @transform_4, window_bounds = array<i64: 1, 64>}, {transform_indices = @transform_5, window_bounds = array<i64: 64, 32>}, {pipeline_mode = #tpu.pipeline_mode<synchronous>, transform_indices = @transform_6, window_bounds = array<i64: 1, 32>}, {transform_indices = @transform_7, window_bounds = array<i64: 16, 32>}]} {
    %c0_i32 = arith.constant 0 : i32
    %0 = arith.cmpi eq, %arg1, %c0_i32 : i32
    %1 = arith.extui %0 : i1 to i32
    %c0_i32_0 = arith.constant 0 : i32
    %2 = arith.cmpi ne, %1, %c0_i32_0 : i32
    scf.if %2 {
      %c0_16 = arith.constant 0 : index
      %c0_17 = arith.constant 0 : index
      %20 = vector.load %arg2[%c0_16, %c0_17] : memref<16x32xf32, #tpu.memory_space<vmem>>, vector<16x32xf32>
      %c0_18 = arith.constant 0 : index
      %c0_19 = arith.constant 0 : index
      %21 = vector.load %arg3[%c0_18, %c0_19] : memref<1x32xf32, #tpu.memory_space<vmem>>, vector<1x32xf32>
      %c0_20 = arith.constant 0 : index
      %c0_21 = arith.constant 0 : index
      %22 = vector.load %arg4[%c0_20, %c0_21] : memref<1x32xf32, #tpu.memory_space<vmem>>, vector<1x32xf32>
      %cst_22 = arith.constant dense<0.000000e+00> : vector<16xf32>
      %23 = vector.multi_reduction <add>, %20, %cst_22 [1] : vector<16x32xf32> to vector<16xf32>
      %24 = vector.shape_cast %23 : vector<16xf32> to vector<16x1xf32>
      %cst_23 = arith.constant 3.200000e+01 : f32
      %25 = vector.broadcast %cst_23 : f32 to vector<16x1xf32>
      %26 = arith.divf %24, %25 : vector<16x1xf32>
      %27 = vector.broadcast %26 : vector<16x1xf32> to vector<16x32xf32>
      %28 = arith.subf %20, %27 : vector<16x32xf32>
      %29 = arith.mulf %28, %28 : vector<16x32xf32>
      %cst_24 = arith.constant dense<0.000000e+00> : vector<16xf32>
      %30 = vector.multi_reduction <add>, %29, %cst_24 [1] : vector<16x32xf32> to vector<16xf32>
      %31 = vector.shape_cast %30 : vector<16xf32> to vector<16x1xf32>
      %cst_25 = arith.constant 0.0322580636 : f32
      %32 = vector.broadcast %cst_25 : f32 to vector<16x1xf32>
      %33 = arith.mulf %31, %32 : vector<16x1xf32>
      %34 = vector.broadcast %26 : vector<16x1xf32> to vector<16x32xf32>
      %35 = arith.subf %20, %34 : vector<16x32xf32>
      %36 = vector.broadcast %21 : vector<1x32xf32> to vector<16x32xf32>
      %37 = arith.mulf %36, %35 : vector<16x32xf32>
      %38 = math.sqrt %33 : vector<16x1xf32>
      %cst_26 = arith.constant 9.99999997E-7 : f32
      %39 = vector.broadcast %cst_26 : f32 to vector<16x1xf32>
      %40 = arith.addf %38, %39 : vector<16x1xf32>
      %41 = vector.broadcast %40 : vector<16x1xf32> to vector<16x32xf32>
      %42 = arith.divf %37, %41 : vector<16x32xf32>
      %43 = vector.broadcast %22 : vector<1x32xf32> to vector<16x32xf32>
      %44 = arith.addf %42, %43 : vector<16x32xf32>
      %45 = arith.truncf %44 : vector<16x32xf32> to vector<16x32xbf16>
      %c0_27 = arith.constant 0 : index
      %c0_28 = arith.constant 0 : index
      %46 = vector.load %arg10[%c0_27, %c0_28] : memref<16x32xbf16, #tpu.memory_space<vmem>>, vector<16x32xbf16>
      tpu.vector_store %arg10[%c0_27, %c0_28], %45 {strides = array<i32>} : memref<16x32xbf16, #tpu.memory_space<vmem>>, vector<16x32xbf16>,
      %cst_29 = arith.constant 0.000000e+00 : f32
      %47 = vector.broadcast %cst_29 : f32 to vector<16x32xf32>
      %c0_30 = arith.constant 0 : index
      %c0_31 = arith.constant 0 : index
      %48 = vector.load %arg11[%c0_30, %c0_31] : memref<16x32xf32, #tpu.memory_space<vmem>>, vector<16x32xf32>
      tpu.vector_store %arg11[%c0_30, %c0_31], %47 {strides = array<i32>} : memref<16x32xf32, #tpu.memory_space<vmem>>, vector<16x32xf32>,
    } else {
    }
    %c0 = arith.constant 0 : index
    %c0_1 = arith.constant 0 : index
    %3 = vector.load %arg10[%c0, %c0_1] : memref<16x32xbf16, #tpu.memory_space<vmem>>, vector<16x32xbf16>
    %c0_2 = arith.constant 0 : index
    %c0_3 = arith.constant 0 : index
    %4 = vector.load %arg5[%c0_2, %c0_3] : memref<32x64xbf16, #tpu.memory_space<vmem>>, vector<32x64xbf16>
    %cst = arith.constant dense<0.000000e+00> : vector<16x64xf32>
    %5 = tpu.matmul %3, %4, %cst {dimension_numbers = #tpu.dot_dimension_numbers<[1], [0], [0], [1], [0, 0, 1, 1], [], []>} : vector<16x32xbf16>, vector<32x64xbf16>, vector<16x64xf32> -> vector<16x64xf32>
    %c0_4 = arith.constant 0 : index
    %c0_5 = arith.constant 0 : index
    %6 = vector.load %arg6[%c0_4, %c0_5] : memref<1x64xf32, #tpu.memory_space<vmem>>, vector<1x64xf32>
    %7 = vector.broadcast %6 : vector<1x64xf32> to vector<16x64xf32>
    %8 = arith.addf %5, %7 : vector<16x64xf32>
    %cst_6 = arith.constant 0.000000e+00 : f32
    %9 = vector.broadcast %cst_6 : f32 to vector<16x64xf32>
    %10 = arith.maximumf %8, %9 : vector<16x64xf32>
    %11 = arith.truncf %10 : vector<16x64xf32> to vector<16x64xbf16>
    %c0_7 = arith.constant 0 : index
    %c0_8 = arith.constant 0 : index
    %12 = vector.load %arg11[%c0_7, %c0_8] : memref<16x32xf32, #tpu.memory_space<vmem>>, vector<16x32xf32>
    %c0_9 = arith.constant 0 : index
    %c0_10 = arith.constant 0 : index
    %13 = vector.load %arg7[%c0_9, %c0_10] : memref<64x32xbf16, #tpu.memory_space<vmem>>, vector<64x32xbf16>
    %cst_11 = arith.constant dense<0.000000e+00> : vector<16x32xf32>
    %14 = tpu.matmul %11, %13, %cst_11 {dimension_numbers = #tpu.dot_dimension_numbers<[1], [0], [0], [1], [0, 0, 1, 1], [], []>} : vector<16x64xbf16>, vector<64x32xbf16>, vector<16x32xf32> -> vector<16x32xf32>
    %15 = arith.addf %12, %14 : vector<16x32xf32>
    %c0_12 = arith.constant 0 : index
    %c0_13 = arith.constant 0 : index
    %16 = vector.load %arg11[%c0_12, %c0_13] : memref<16x32xf32, #tpu.memory_space<vmem>>, vector<16x32xf32>
    tpu.vector_store %arg11[%c0_12, %c0_13], %15 {strides = array<i32>} : memref<16x32xf32, #tpu.memory_space<vmem>>, vector<16x32xf32>,
    %c0_i32_14 = arith.constant 0 : i32
    %17 = arith.cmpi eq, %arg1, %c0_i32_14 : i32
    %18 = arith.extui %17 : i1 to i32
    %c0_i32_15 = arith.constant 0 : i32
    %19 = arith.cmpi ne, %18, %c0_i32_15 : i32
    scf.if %19 {
      %c0_16 = arith.constant 0 : index
      %c0_17 = arith.constant 0 : index
      %20 = vector.load %arg2[%c0_16, %c0_17] : memref<16x32xf32, #tpu.memory_space<vmem>>, vector<16x32xf32>
      %c0_18 = arith.constant 0 : index
      %c0_19 = arith.constant 0 : index
      %21 = vector.load %arg11[%c0_18, %c0_19] : memref<16x32xf32, #tpu.memory_space<vmem>>, vector<16x32xf32>
      %22 = arith.addf %20, %21 : vector<16x32xf32>
      %c0_20 = arith.constant 0 : index
      %c0_21 = arith.constant 0 : index
      %23 = vector.load %arg8[%c0_20, %c0_21] : memref<1x32xf32, #tpu.memory_space<vmem>>, vector<1x32xf32>
      %24 = vector.broadcast %23 : vector<1x32xf32> to vector<16x32xf32>
      %25 = arith.addf %22, %24 : vector<16x32xf32>
      %c0_22 = arith.constant 0 : index
      %c0_23 = arith.constant 0 : index
      %26 = vector.load %arg9[%c0_22, %c0_23] : memref<16x32xf32, #tpu.memory_space<vmem>>, vector<16x32xf32>
      tpu.vector_store %arg9[%c0_22, %c0_23], %25 {strides = array<i32>} : memref<16x32xf32, #tpu.memory_space<vmem>>, vector<16x32xf32>,
    } else {
    }
    return
  }
  func.func @transform_0(%arg0: i32, %arg1: i32) -> (i32, i32) {
    %c0_i32 = arith.constant 0 : i32
    %c0_i32_0 = arith.constant 0 : i32
    return %arg0, %c0_i32 : i32, i32
  }
  func.func @transform_1(%arg0: i32, %arg1: i32) -> (i32, i32) {
    %c0_i32 = arith.constant 0 : i32
    %c0_i32_0 = arith.constant 0 : i32
    %c0_i32_1 = arith.constant 0 : i32
    return %c0_i32, %c0_i32_0 : i32, i32
  }
  func.func @transform_2(%arg0: i32, %arg1: i32) -> (i32, i32) {
    %c0_i32 = arith.constant 0 : i32
    %c0_i32_0 = arith.constant 0 : i32
    %c0_i32_1 = arith.constant 0 : i32
    return %c0_i32, %c0_i32_0 : i32, i32
  }
  func.func @transform_3(%arg0: i32, %arg1: i32) -> (i32, i32) {
    %c0_i32 = arith.constant 0 : i32
    %c0_i32_0 = arith.constant 0 : i32
    return %c0_i32, %arg1 : i32, i32
  }
  func.func @transform_4(%arg0: i32, %arg1: i32) -> (i32, i32) {
    %c0_i32 = arith.constant 0 : i32
    %c0_i32_0 = arith.constant 0 : i32
    return %c0_i32, %arg1 : i32, i32
  }
  func.func @transform_5(%arg0: i32, %arg1: i32) -> (i32, i32) {
    %c0_i32 = arith.constant 0 : i32
    %c0_i32_0 = arith.constant 0 : i32
    return %arg1, %c0_i32 : i32, i32
  }
  func.func @transform_6(%arg0: i32, %arg1: i32) -> (i32, i32) {
    %c0_i32 = arith.constant 0 : i32
    %c0_i32_0 = arith.constant 0 : i32
    %c0_i32_1 = arith.constant 0 : i32
    return %c0_i32, %c0_i32_0 : i32, i32
  }
  func.func @transform_7(%arg0: i32, %arg1: i32) -> (i32, i32) {
    %c0_i32 = arith.constant 0 : i32
    %c0_i32_0 = arith.constant 0 : i32
    return %arg0, %c0_i32 : i32, i32
  }
}

module attributes {stable_mosaic.version = 11 : i64} {
  func.func @_ln_out_kernel(%arg0: i32, %arg1: memref<16x32xf32, #tpu.memory_space<vmem>>, %arg2: memref<1x32xf32, #tpu.memory_space<vmem>>, %arg3: memref<1x32xf32, #tpu.memory_space<vmem>>, %arg4: memref<32x128xbf16, #tpu.memory_space<vmem>>, %arg5: memref<1x128xf32, #tpu.memory_space<vmem>>, %arg6: memref<16x128xf32, #tpu.memory_space<vmem>>) attributes {dimension_semantics = [#tpu.dimension_semantics<parallel>], iteration_bounds = array<i64: 1>, scalar_prefetch = 0 : i64, scratch_operands = 0 : i64, tpu.core_type = #tpu.core_type<tc>, window_params = [{transform_indices = @transform_0, window_bounds = array<i64: 16, 32>}, {pipeline_mode = #tpu.pipeline_mode<synchronous>, transform_indices = @transform_1, window_bounds = array<i64: 1, 32>}, {pipeline_mode = #tpu.pipeline_mode<synchronous>, transform_indices = @transform_2, window_bounds = array<i64: 1, 32>}, {pipeline_mode = #tpu.pipeline_mode<synchronous>, transform_indices = @transform_3, window_bounds = array<i64: 32, 128>}, {pipeline_mode = #tpu.pipeline_mode<synchronous>, transform_indices = @transform_4, window_bounds = array<i64: 1, 128>}, {transform_indices = @transform_5, window_bounds = array<i64: 16, 128>}]} {
    %c0 = arith.constant 0 : index
    %c0_0 = arith.constant 0 : index
    %0 = vector.load %arg1[%c0, %c0_0] : memref<16x32xf32, #tpu.memory_space<vmem>>, vector<16x32xf32>
    %c0_1 = arith.constant 0 : index
    %c0_2 = arith.constant 0 : index
    %1 = vector.load %arg2[%c0_1, %c0_2] : memref<1x32xf32, #tpu.memory_space<vmem>>, vector<1x32xf32>
    %c0_3 = arith.constant 0 : index
    %c0_4 = arith.constant 0 : index
    %2 = vector.load %arg3[%c0_3, %c0_4] : memref<1x32xf32, #tpu.memory_space<vmem>>, vector<1x32xf32>
    %cst = arith.constant dense<0.000000e+00> : vector<16xf32>
    %3 = vector.multi_reduction <add>, %0, %cst [1] : vector<16x32xf32> to vector<16xf32>
    %4 = vector.shape_cast %3 : vector<16xf32> to vector<16x1xf32>
    %cst_5 = arith.constant 3.200000e+01 : f32
    %5 = vector.broadcast %cst_5 : f32 to vector<16x1xf32>
    %6 = arith.divf %4, %5 : vector<16x1xf32>
    %7 = vector.broadcast %6 : vector<16x1xf32> to vector<16x32xf32>
    %8 = arith.subf %0, %7 : vector<16x32xf32>
    %9 = arith.mulf %8, %8 : vector<16x32xf32>
    %cst_6 = arith.constant dense<0.000000e+00> : vector<16xf32>
    %10 = vector.multi_reduction <add>, %9, %cst_6 [1] : vector<16x32xf32> to vector<16xf32>
    %11 = vector.shape_cast %10 : vector<16xf32> to vector<16x1xf32>
    %cst_7 = arith.constant 0.0322580636 : f32
    %12 = vector.broadcast %cst_7 : f32 to vector<16x1xf32>
    %13 = arith.mulf %11, %12 : vector<16x1xf32>
    %14 = vector.broadcast %6 : vector<16x1xf32> to vector<16x32xf32>
    %15 = arith.subf %0, %14 : vector<16x32xf32>
    %16 = vector.broadcast %1 : vector<1x32xf32> to vector<16x32xf32>
    %17 = arith.mulf %16, %15 : vector<16x32xf32>
    %18 = math.sqrt %13 : vector<16x1xf32>
    %cst_8 = arith.constant 9.99999997E-7 : f32
    %19 = vector.broadcast %cst_8 : f32 to vector<16x1xf32>
    %20 = arith.addf %18, %19 : vector<16x1xf32>
    %21 = vector.broadcast %20 : vector<16x1xf32> to vector<16x32xf32>
    %22 = arith.divf %17, %21 : vector<16x32xf32>
    %23 = vector.broadcast %2 : vector<1x32xf32> to vector<16x32xf32>
    %24 = arith.addf %22, %23 : vector<16x32xf32>
    %25 = arith.truncf %24 : vector<16x32xf32> to vector<16x32xbf16>
    %c0_9 = arith.constant 0 : index
    %c0_10 = arith.constant 0 : index
    %26 = vector.load %arg4[%c0_9, %c0_10] : memref<32x128xbf16, #tpu.memory_space<vmem>>, vector<32x128xbf16>
    %cst_11 = arith.constant dense<0.000000e+00> : vector<16x128xf32>
    %27 = tpu.matmul %25, %26, %cst_11 {dimension_numbers = #tpu.dot_dimension_numbers<[1], [0], [0], [1], [0, 0, 1, 1], [], []>} : vector<16x32xbf16>, vector<32x128xbf16>, vector<16x128xf32> -> vector<16x128xf32>
    %c0_12 = arith.constant 0 : index
    %c0_13 = arith.constant 0 : index
    %28 = vector.load %arg5[%c0_12, %c0_13] : memref<1x128xf32, #tpu.memory_space<vmem>>, vector<1x128xf32>
    %29 = vector.broadcast %28 : vector<1x128xf32> to vector<16x128xf32>
    %30 = arith.addf %27, %29 : vector<16x128xf32>
    %c0_14 = arith.constant 0 : index
    %c0_15 = arith.constant 0 : index
    %31 = vector.load %arg6[%c0_14, %c0_15] : memref<16x128xf32, #tpu.memory_space<vmem>>, vector<16x128xf32>
    tpu.vector_store %arg6[%c0_14, %c0_15], %30 {strides = array<i32>} : memref<16x128xf32, #tpu.memory_space<vmem>>, vector<16x128xf32>,
    return
  }
  func.func @transform_0(%arg0: i32) -> (i32, i32) {
    %c0_i32 = arith.constant 0 : i32
    %c0_i32_0 = arith.constant 0 : i32
    return %arg0, %c0_i32 : i32, i32
  }
  func.func @transform_1(%arg0: i32) -> (i32, i32) {
    %c0_i32 = arith.constant 0 : i32
    %c0_i32_0 = arith.constant 0 : i32
    %c0_i32_1 = arith.constant 0 : i32
    return %c0_i32, %c0_i32_0 : i32, i32
  }
  func.func @transform_2(%arg0: i32) -> (i32, i32) {
    %c0_i32 = arith.constant 0 : i32
    %c0_i32_0 = arith.constant 0 : i32
    %c0_i32_1 = arith.constant 0 : i32
    return %c0_i32, %c0_i32_0 : i32, i32
  }
  func.func @transform_3(%arg0: i32) -> (i32, i32) {
    %c0_i32 = arith.constant 0 : i32
    %c0_i32_0 = arith.constant 0 : i32
    %c0_i32_1 = arith.constant 0 : i32
    return %c0_i32, %c0_i32_0 : i32, i32
  }
  func.func @transform_4(%arg0: i32) -> (i32, i32) {
    %c0_i32 = arith.constant 0 : i32
    %c0_i32_0 = arith.constant 0 : i32
    %c0_i32_1 = arith.constant 0 : i32
    return %c0_i32, %c0_i32_0 : i32, i32
  }
  func.func @transform_5(%arg0: i32) -> (i32, i32) {
    %c0_i32 = arith.constant 0 : i32
    %c0_i32_0 = arith.constant 0 : i32
    return %arg0, %c0_i32 : i32, i32
  }
}

</mosaic_0001>

<bundles_post_ra>
// kernel: transformer_seg_forward.8
= control target key start
LH: loop header
LB: loop body
LE: loop exit
PB: predicated region body
PF: predicated region fallthrough
CT: control target
= control target key end

     0   :  { %v88_v0 = vmov 0.0   ;;  %vm89_vm0 = vmmov 0   ;;  %vm23_vm1 = vcmask 130048   ;;  %vm68_vm2 = vcmask 261120   ;;  %s120_s1 = inlined_call_operand.vmem [shape: bf16[16,32], index: 1, kind: input, shape index: {}]   ;;  %s121_s0 = inlined_call_operand.vmem [shape: f32[16,16], index: 0, kind: input, shape index: {}]   ;;  %s122_s2 = inlined_call_operand.vmem [shape: f32[16,32], index: 2, kind: output, shape index: {}]  }
   0x1   :  { %79 = vmatprep.subr.bf16.mxu0 %v88_v0  ;;  %v87_v1 = vld [vmem:[%s120_s1] sm:$0xff]   ;;  %81 = vmatprep.mubr.msk.bf16.mxu0 %vm89_vm0, %v88_v0  ;;  %v13_v3 = vld [vmem:[%s121_s0 + $0x8] sm:$0xff] }
   0x2   :  { %v12_v2 = vld [vmem:[%s121_s0] sm:$0xff]  ;;  %80 = vmatpush3.bf16.msra.mxu0 %v87_v1 }
   0x3   :  { %v14_v4 = vpack.c.bf16 %v13_v3, %v12_v2 }
   0x5   :  { %82 = vmatmul.mubr.msk.bf16.vlgmr.msra.gmra.mxu0 %vm23_vm1, %v14_v4 }
  0xc5   :  { %v61_v5 = vpop.f32.mrf.mxu0 }
  0xc6   :  { %69 = vst.msk [vmem:[%s122_s2] sm:$0xff] %vm68_vm2, %v61_v5 }
  0xc7   :  { %v83_v6 = vpop.f32.mrf.mxu0 }
  0xc9   :  { %v64_v7 = vpop.f32.mrf.mxu0 }
  0xca   :  { %70 = vst.msk [vmem:[%s122_s2 + $0x8] sm:$0xff] %vm68_vm2, %v64_v7 }
  0xcb   :  { %v84_v8 = vpop.f32.mrf.mxu0 }

// kernel: transformer_seg_forward.9
= control target key start
LH: loop header
LB: loop body
LE: loop exit
PB: predicated region body
PF: predicated region fallthrough
CT: control target
= control target key end

     0   :  { %vm28_vm0 = vcmask 261120   ;;  %v228_v14 = vmov 0.0   ;;  %vm229_vm1 = vmmov 0   ;;  %vm162_vm6 = vcmask 257024   ;;  %s231_s14 = smov 96   ;;  %s322_s0 = inlined_call_operand.vmem [shape: f32[16,32], index: 0, kind: input, shape index: {}]   ;;  %s323_s3 = inlined_call_operand.vmem [shape: bf16[32,96], index: 3, kind: input, shape index: {}]   ;;  %s324_s1 = inlined_call_operand.vmem [shape: f32[1,32], index: 1, kind: input, shape index: {}]   ;;  %s325_s2 = inlined_call_operand.vmem [shape: f32[1,32], index: 2, kind: input, shape index: {}]   ;;  %s326_s4 = inlined_call_operand.vmem [shape: f32[1,96], index: 4, kind: input, shape index: {}]   ;;  %s327_s5 = inlined_call_operand.vmem [shape: bf16[16,32], index: 5, kind: output, shape index: {0}]   ;;  %s328_s7 = inlined_call_operand.vmem [shape: bf16[16,32], index: 7, kind: output, shape index: {2}]   ;;  %s329_s6 = inlined_call_operand.vmem [shape: bf16[16,32], index: 6, kind: output, shape index: {1}]  }
   0x1   :  { %v24_v0 = vld [vmem:[%s322_s0] sm:$0xff]  ;;  %v25_v1 = vld [vmem:[%s322_s0 + $0x8] sm:$0xff]  ;;  %206 = vmatprep.subr.bf16.mxu0 %v228_v14  ;;  %210 = vmatprep.mubr.msk.bf16.mxu0 %vm229_vm1, %v228_v14 }
   0x2   :  { %v29_v2 = vsel %vm28_vm0, %v24_v0, 0.0  ;;  %v32_v3 = vsel %vm28_vm0, %v25_v1, 0.0  ;;  %v218_v15 = vld [vmem:[%s323_s3 + $0x8] sm:$0xff]   ;;  %v219_v16 = vld [vmem:[%s323_s3] sm:$0xff]  }
   0x3   :  { %30 = vadd.xlane.f32.xlu0 %v29_v2  ;;  %207 = vmatpush3.bf16.msra.mxu0 %v218_v15  ;;  %v193_v33 = vld [vmem:[%s324_s1] ss:$0 sm:$0xff] }
   0x4   :  { %208 = vmatprep.subr.bf16.mxu0 %v228_v14  ;;  %v194_v39 = vld [vmem:[%s325_s2] ss:$0 sm:$0xff]  ;;  %s230_s2 = smov 64  }
   0x5   :  { %v195_v44 = vld [vmem:[%s326_s4] ss:$0 sm:$0xff] }
   0x7   :  { %33 = vadd.xlane.f32.xlu0 %v32_v3  ;;  %209 = vmatpush3.bf16.msra.mxu0 %v219_v16 }
  0x8c   :  { %v31_v4 = vpop.xlane.xlu0 %30 }
  0x8d   :  { %v36_v5 = vmul.f32 0.03125, %v31_v4 }
  0x8f   :  { %v38_v6 = vsub.f32 %v24_v0, %v36_v5 }
  0x90   :  { %v34_v7 = vpop.xlane.xlu0 %33 }
  0x91   :  { %v37_v8 = vmul.f32 0.03125, %v34_v7  ;;  %v40_v9 = vmul.f32 %v38_v6, %v38_v6  ;;  %v56_v35 = vmul.f32 %v193_v33, %v38_v6 }
  0x93   :  { %v39_v10 = vsub.f32 %v25_v1, %v37_v8  ;;  %v42_v11 = vsel %vm28_vm0, %v40_v9, 0.0 }
  0x94   :  { %43 = vadd.xlane.f32.xlu1 %v42_v11 }
  0x95   :  { %v41_v12 = vmul.f32 %v39_v10, %v39_v10  ;;  %v57_v36 = vmul.f32 %v193_v33, %v39_v10 }
  0x97   :  { %v45_v13 = vsel %vm28_vm0, %v41_v12, 0.0 }
  0x98   :  { %46 = vadd.xlane.f32.xlu1 %v45_v13 }
 0x11d   :  { %v44_v17 = vpop.xlane.xlu1 %43 }
 0x11e   :  { %v48_v18 = vmul.f32 0.032258064, %v44_v17 }
 0x120   :  { %220 = vrsqrt.f32 %v48_v18  ;;  %vm60_vm2 = vcmp.eq.f32.partialorder %v48_v18, inf  ;;  %v63_v23 = vand.u32 2147483648, %v48_v18  ;;  %vm62_vm3 = vcmp.eq.f32.partialorder %v48_v18, 0.0 }
 0x121   :  { %v47_v19 = vpop.xlane.xlu1 %46 }
 0x122   :  { %v49_v20 = vmul.f32 0.032258064, %v47_v19 }
 0x124   :  { %222 = vrsqrt.f32 %v49_v20  ;;  %vm67_vm4 = vcmp.eq.f32.partialorder %v49_v20, inf  ;;  %v70_v29 = vand.u32 2147483648, %v49_v20  ;;  %vm69_vm5 = vcmp.eq.f32.partialorder %v49_v20, 0.0 }
 0x12d   :  { %v221_v21 = vpop.eup %220 }
 0x12e   :  { %v59_v22 = vmul.f32 %v221_v21, %v48_v18 }
 0x130   :  { %v61_v24 = vsel %vm60_vm2, %v48_v18, %v59_v22 }
 0x131   :  { %v223_v25 = vpop.eup %222  ;;  %v64_v26 = vsel %vm62_vm3, %v63_v23, %v61_v24 }
 0x132   :  { %v72_v27 = vadd.f32 1e-06, %v64_v26  ;;  %v66_v28 = vmul.f32 %v223_v25, %v49_v20 }
 0x134   :  { %224 = vrcp.f32 %v72_v27  ;;  %v68_v30 = vsel %vm67_vm4, %v49_v20, %v66_v28 }
 0x135   :  { %v71_v31 = vsel %vm69_vm5, %v70_v29, %v68_v30 }
 0x136   :  { %v73_v32 = vadd.f32 1e-06, %v71_v31 }
 0x138   :  { %226 = vrcp.f32 %v73_v32 }
 0x141   :  { %v225_v34 = vpop.eup %224 }
 0x142   :  { %v75_v37 = vmul.f32 %v225_v34, %v56_v35 }
 0x144   :  { %v84_v41 = vadd.f32 %v194_v39, %v75_v37 }
 0x145   :  { %v227_v38 = vpop.eup %226 }
 0x146   :  { %v77_v40 = vmul.f32 %v227_v38, %v57_v36 }
 0x148   :  { %v85_v42 = vadd.f32 %v194_v39, %v77_v40 }
 0x14a   :  { %v86_v43 = vpack.c.bf16 %v85_v42, %v84_v41 }
 0x14c   :  { %211 = vmatmul.mubr.msk.bf16.vlgmr.msra.gmra.mxu0 %vm28_vm0, %v86_v43 }
 0x20c   :  { %v147_v45 = vpop.f32.mrf.mxu0 }
 0x20d   :  { %v148_v46 = vadd.f32 %v195_v44, %v147_v45 }
 0x20e   :  { %v212_v47 = vpop.f32.mrf.mxu0 }
 0x20f   :  { %v201_v48 = vpack.c.bf16 %v148_v46, %v148_v46 }
 0x210   :  { %v150_v49 = vpop.f32.mrf.mxu0 }
 0x211   :  { %163 = vst.msk [vmem:[%s327_s5] sm:$0xf] %vm162_vm6, %v201_v48  ;;  %v151_v50 = vadd.f32 %v195_v44, %v150_v49  ;;  %173 = vrot.lane.b32.xlu1 %v201_v48, %s230_s2  ;;  %165 = vrot.lane.b32.xlu0 %v201_v48, %s231_s14 }
 0x212   :  { %v213_v51 = vpop.f32.mrf.mxu0 }
 0x213   :  { %v202_v52 = vpack.c.bf16 %v151_v50, %v151_v50 }
 0x215   :  { %164 = vst.msk [vmem:[%s327_s5 + $0x4] sm:$0xf] %vm162_vm6, %v202_v52  ;;  %167 = vrot.lane.b32.xlu1 %v202_v52, %s231_s14 }
 0x219   :  { %175 = vrot.lane.b32.xlu1 %v202_v52, %s230_s2 }
 0x283   :  { %v174_v53 = vpop.permute.xlu1 %173  ;;  %v166_v54 = vpop.permute.xlu0 %165 }
 0x284   :  { %179 = vst.msk [vmem:[%s328_s7] sm:$0xf] %vm162_vm6, %v174_v53  ;;  %171 = vst.msk [vmem:[%s329_s6] sm:$0xf] %vm162_vm6, %v166_v54 }
 0x287   :  { %v168_v55 = vpop.permute.xlu1 %167 }
 0x288   :  { %172 = vst.msk [vmem:[%s329_s6 + $0x4] sm:$0xf] %vm162_vm6, %v168_v55 }
 0x28b   :  { %v176_v56 = vpop.permute.xlu1 %175 }
 0x28c   :  { %180 = vst.msk [vmem:[%s328_s7 + $0x4] sm:$0xf] %vm162_vm6, %v176_v56 }

// kernel: transformer_seg_forward.10
= control target key start
LH: loop header
LB: loop body
LE: loop exit
PB: predicated region body
PF: predicated region fallthrough
CT: control target
= control target key end

     0   :  { %s1486_s24 = smov 0   ;;  %s1488_s25 = smov 0   ;;  %s1700_s0 = inlined_call_operand.vmem [shape: f32[2,1,8], index: 0, kind: input, shape index: {}]   ;;  %s1701_s1 = inlined_call_operand.vmem [shape: bf16[2,8,32], index: 1, kind: input, shape index: {}]   ;;  %s1702_s2 = inlined_call_operand.vmem [shape: bf16[2,8,32], index: 2, kind: input, shape index: {}]   ;;  %s1703_s3 = inlined_call_operand.vmem [shape: bf16[2,8,32], index: 3, kind: input, shape index: {}]   ;;  %s1704_s4 = inlined_call_operand.vmem [shape: f32[2,8,32], index: 4, kind: input, shape index: {}, may-alias: {4,7}]   ;;  %s1705_s5 = inlined_call_operand.vmem [shape: bf16[32,32], index: 5, kind: input, shape index: {}]   ;;  %s1706_s6 = inlined_call_operand.vmem [shape: f32[1,32], index: 6, kind: input, shape index: {}]   ;;  %s1707_s7 = inlined_call_operand.vmem [shape: f32[2,8,32], index: 7, kind: output, shape index: {}, may-alias: {4,7}]  }
   0x1   :  { %s1490_s26 = smov 0  }
   0x2 LB: > { %s36_s27 = sadd.s32 1, %s1427_s25  ;;  %p1238_p0 = scmp.ge.s32.totalorder %s1431_s26, 1  ;;  %s1431_s26 = sphi %s1490_s26, %s17_s26   ;;  %s1427_s25 = sphi %s1488_s25, %s1709_s25   ;;  %s1423_s24 = sphi %s1486_s24, %s1708_s24  }
   0x3   : > { %p38_p1 = scmp.ge.s32.totalorder %s36_s27, 2  ;;  %p317_p2 = scmp.lt.s32.totalorder %s1431_s26, 3 }
   0x5   : > { %s1711_s27 = smov (%p38_p1, %s36_s27), 0  ;;  %p318_p3 = pnand %p1238_p0, %p317_p2 }
   0x6   : > { %p380_p4 = scmp.lt.s32.totalorder (!%p318_p3), %s1423_s24, 1  ;;  %s1437_s15 = smov (!%p318_p3), 120  }
   0x7   : > { %321 = sbr.rel (%p318_p3) target bundleno = 1580 (0x62c), region = 48  ;;  %s1438_s16 = smov (!%p318_p3), 112  }
   0x8   : > { %s1439_s17 = smov (!%p318_p3), 104   ;;  %s1443_s21 = smov (!%p318_p3), 8  }
   0x9   : > { %s1444_s22 = smov (!%p318_p3), 16   ;;  %s1445_s23 = smov (!%p318_p3), 24  }
   0xc   : > { %v1433_v0 = vmov 0.0   ;;  %vm1434_vm0 = vmmov 0   ;;  %s1713_s24 = smov (!%p380_p4, %s1423_s24), 1  ;;  %vm441_vm1 = vcmask 64512   ;;  %vm426_vm2 = vcmask 31744  }
   0xd   : > { %1281 = vmatprep.subr.bf16.mxu0 %v1433_v0  ;;  %1283 = vmatprep.mubr.msk.bf16.mxu0 %vm1434_vm0, %v1433_v0  ;;  %s1513_s28 = sshll.u32 %s1713_s24, 2  ;;  %v1435_v4 = vmov -inf   ;;  %428 = vst.msk [vmem:[#allocation3] sm:$0xff] %vm426_vm2, %v1433_v0  ;;  %s385_s14 = scalar_lea.vmem %s1700_s0, %s1713_s24  ;;  %v1436_v12 = vmov 0   ;;  %vm510_vm3 = vcmask 7168   ;;  %vm523_vm4 = vcmask 1043456  }
   0xe   : > { %1287 = vmatprep.subr.bf16.mxu1 %v1433_v0  ;;  %1289 = vmatprep.mubr.msk.bf16.mxu1 %vm1434_vm0, %v1433_v0  ;;  %s399_s8 = scalar_lea.vmem %s1702_s2, %s1513_s28  ;;  %s392_s11 = scalar_lea.vmem %s1701_s1, %s1513_s28  ;;  %427 = vst.msk [vmem:[#allocation2] sm:$0xff] %vm426_vm2, %v1435_v4  ;;  %v1533_v5 = vld [vmem:[%s385_s14] ss:$0 sm:$0xff]  ;;  %v1440_v51 = vmov 1   ;;  %v1441_v58 = vmov 2   ;;  %vm648_vm5 = vcmask 15368  }
   0xf   : > { %v432_v1 = vld [vmem:[%s399_s8] sm:$0xf]  ;;  %1374 = vset.pattern.permute.xlu0 %v1436_v12  ;;  %s406_s20 = scalar_lea.vmem %s1703_s3, %s1513_s28  ;;  %1375 = vset.pattern.permute.xlu1 %v1440_v51  ;;  %vm789_vm6 = vcmask 23568   ;;  %vm927_vm7 = vcmask 31768   ;;  %vm429_vm8 = vcmask 261120   ;;  %vm714_vm9 = vcmask 130112  }
  0x10   : > { %v446_v2 = vsel %vm441_vm1, %v432_v1, 0  ;;  %v431_v3 = vld [vmem:[%s392_s11] sm:$0xf]  ;;  %v1248_v13 = vcombine.low %v432_v1, %v432_v1  ;;  %430 = vst.msk [vmem:[#allocation4] sm:$0xff] %vm429_vm8, %v1433_v0  ;;  %vm852_vm10 = vcmask 195712   ;;  %vm990_vm11 = vcmask 261312  }
  0x11   : > { %1282 = vmatpush3.bf16.xpose.msra.mxu0 %v446_v2  ;;  %v1247_v14 = vcombine.low %v431_v3, %v431_v3  ;;  %v1558_v19 = vld [vmem:[%s406_s20] sm:$0xf]  ;;  %v1442_v2 = vmov 3   ;;  %s1242_s9 = sshll.u32 %s1713_s24, 3 }
  0x12   : > { %1299 = vmatprep.subr.bf16.mxu0 %v1433_v0  ;;  %578 = vrot.lane.b32.xlu1 %v1248_v13, %s1437_s15  ;;  %v525_v20 = vsel %vm523_vm4, %v1558_v19, 0  ;;  %v1250_v62 = vcombine.low %v1558_v19, %v1558_v19  ;;  %s413_s12 = scalar_lea.vmem %s1704_s4, %s1242_s9 }
  0x13   : > { %1288 = vmatpush3.bf16.msra.mxu1 %v525_v20 }
  0x14   : > { %1293 = vmatprep.subr.bf16.mxu1 %v1433_v0 }
  0x15   : > { %v1544_v15 = vld [vmem:[#allocation2] sm:$0xff] }
  0x16   : > { %573 = vrot.lane.b32.xlu1 %v1247_v14, %s1437_s15 }
  0x18   : > { %1284 = vmatmul.mubr.msk.bf16.vlgmr.msra.gmra.mxu0 %vm441_vm1, %v431_v3 }
  0x19   : > { %1301 = vmatprep.mubr.msk.bf16.mxu0 %vm1434_vm0, %v1433_v0 }
  0x1a   : > { %719 = vrot.lane.b32.xlu1 %v1248_v13, %s1438_s16 }
  0x1e   : > { %717 = vrot.lane.b32.xlu1 %v1247_v14, %s1438_s16 }
  0x22   : > { %857 = vrot.lane.b32.xlu1 %v1248_v13, %s1439_s17 }
  0x26   : > { %855 = vrot.lane.b32.xlu1 %v1247_v14, %s1439_s17 }
  0x84   : > { %v579_v24 = vpop.permute.xlu1 %578 }
  0x85   : > { %v584_v27 = vsel %vm441_vm1, %v579_v24, 0 }
  0x88   : > { %v574_v25 = vpop.permute.xlu1 %573 }
  0x8c   : > { %v720_v29 = vpop.permute.xlu1 %719 }
  0x8d   : > { %v725_v31 = vsel %vm441_vm1, %v720_v29, 0 }
  0x90   : > { %v718_v30 = vpop.permute.xlu1 %717 }
  0x94   : > { %v858_v32 = vpop.permute.xlu1 %857 }
  0x95   : > { %v863_v33 = vsel %vm441_vm1, %v858_v32, 0 }
  0x98   : > { %v856_v34 = vpop.permute.xlu1 %855 }
  0xd8   : > { %v482_v6 = vpop.f32.mrf.mxu0 }
  0xd9   : > { %v483_v7 = vadd.f32 %v1533_v5, %v482_v6 }
  0xda   : > { %v1285_v8 = vpop.f32.mrf.mxu0 }
  0xdb   : > { %v489_v9 = vsel %vm441_vm1, %v483_v7, -inf }
  0xdc   : > { %v485_v10 = vpop.f32.mrf.mxu0  ;;  %490 = vmax.xlane.f32.xlu0 %v489_v9 }
  0xde   : > { %v1286_v11 = vpop.f32.mrf.mxu0 }
 0x165   : > { %v491_v16 = vpop.xlane.xlu0 %490 }
 0x166   : > { %v1547_v17 = vmax.f32 %v1544_v15, %v491_v16 }
 0x168   : > { %v493_v18 = vsub.f32 %v1544_v15, %v1547_v17  ;;  %569 = vst.msk [vmem:[#allocation2] sm:$0xff] %vm510_vm3, %v1547_v17  ;;  %498 = vperm.xlu0 %1374, %v1547_v17   ;;  %v504_v15 = vld [vmem:[#allocation3] sm:$0xff] }
 0x16c   : > { %1376 = vset.pattern.permute.xlu0 %v1441_v58 }
 0x16f   : > { %v626_v60 = vld [vmem:[#allocation2] sm:$0xff] }
 0x1e3   : > { %v499_v21 = vpop.permute.xlu0 %498 }
 0x1e4   : > { %v501_v22 = vsub.f32 %v483_v7, %v499_v21 }
 0x1e6   : > { %v502_v23 = vmul.f32 1.442695, %v501_v22 }
 0x1e8   : > { %1391 = vpow2.f32 %v502_v23 }
 0x1f5   : > { %v1563_v26 = vpop.eup %1391 }
 0x1f6   : > { %v519_v28 = vpack.c.bf16 %v1563_v26, %v1563_v26  ;;  %v506_v10 = vsel %vm441_vm1, %v1563_v26, 0.0 }
 0x1f8   : > { %1290 = vmatmul.mubr.msk.bf16.vlgmr.msra.gmra.mxu1 %vm441_vm1, %v519_v28 }
 0x1f9   : > { %1294 = vmatpush3.bf16.xpose.msra.mxu1 %v584_v27  ;;  %1295 = vmatprep.mubr.msk.bf16.mxu1 %vm1434_vm0, %v1433_v0 }
 0x1fa   : > { %1305 = vmatprep.subr.bf16.mxu1 %v1433_v0 }
 0x200   : > { %1296 = vmatmul.mubr.msk.bf16.vlgmr.msra.gmra.mxu1 %vm441_vm1, %v574_v25 }
 0x201   : > { %1306 = vmatpush3.bf16.xpose.msra.mxu1 %v725_v31  ;;  %1307 = vmatprep.mubr.msk.bf16.mxu1 %vm1434_vm0, %v1433_v0 }
 0x202   : > { %1317 = vmatprep.subr.bf16.mxu1 %v1433_v0 }
 0x208   : > { %1308 = vmatmul.mubr.msk.bf16.vlgmr.msra.gmra.mxu1 %vm441_vm1, %v718_v30 }
 0x209   : > { %1318 = vmatpush3.bf16.xpose.msra.mxu1 %v863_v33  ;;  %1319 = vmatprep.mubr.msk.bf16.mxu1 %vm1434_vm0, %v1433_v0 }
 0x20a   : > { %1329 = vmatprep.subr.bf16.mxu1 %v1433_v0 }
 0x210   : > { %1320 = vmatmul.mubr.msk.bf16.vlgmr.msra.gmra.mxu1 %vm441_vm1, %v856_v34 }
 0x211   : > { %1333 = vmatprep.mubr.msk.bf16.mxu1 %vm1434_vm0, %v1433_v0 }
 0x2b8   : > { %v1585_v35 = vpop.f32.mrf.mxu1 }
 0x2ba   : > { %v1291_v36 = vpop.f32.mrf.mxu1 }
 0x2bc   : > { %v564_v37 = vpop.f32.mrf.mxu1 }
 0x2be   : > { %v1292_v38 = vpop.f32.mrf.mxu1 }
 0x2c0   : > { %v620_v39 = vpop.f32.mrf.mxu1 }
 0x2c1   : > { %v621_v40 = vadd.f32 %v1533_v5, %v620_v39  ;;  %v494_v39 = vmul.f32 1.442695, %v493_v18 }
 0x2c2   : > { %v1297_v41 = vpop.f32.mrf.mxu1 }
 0x2c3   : > { %v627_v42 = vsel %vm441_vm1, %v621_v40, -inf }
 0x2c4   : > { %628 = vmax.xlane.f32.xlu1 %v627_v42  ;;  %v623_v43 = vpop.f32.mrf.mxu1 }
 0x2c6   : > { %v1298_v44 = vpop.f32.mrf.mxu1 }
 0x2c8   : > { %v761_v45 = vpop.f32.mrf.mxu1 }
 0x2c9   : > { %v762_v46 = vadd.f32 %v1533_v5, %v761_v45 }
 0x2ca   : > { %v1309_v47 = vpop.f32.mrf.mxu1 }
 0x2cb   : > { %v768_v48 = vsel %vm441_vm1, %v762_v46, -inf }
 0x2cc   : > { %769 = vmax.xlane.f32.xlu0 %v768_v48  ;;  %v764_v49 = vpop.f32.mrf.mxu1 }
 0x2ce   : > { %v1310_v50 = vpop.f32.mrf.mxu1 }
 0x2d0   : > { %v899_v52 = vpop.f32.mrf.mxu1 }
 0x2d1   : > { %v900_v53 = vadd.f32 %v1533_v5, %v899_v52 }
 0x2d2   : > { %v1321_v54 = vpop.f32.mrf.mxu1 }
 0x2d3   : > { %v906_v55 = vsel %vm441_vm1, %v900_v53, -inf }
 0x2d4   : > { %v902_v56 = vpop.f32.mrf.mxu1  ;;  %907 = vmax.xlane.f32.xlu1 %v906_v55 }
 0x2d6   : > { %v1322_v57 = vpop.f32.mrf.mxu1 }
 0x34d   : > { %v629_v59 = vpop.xlane.xlu1 %628 }
 0x34e   : > { %v630_v61 = vmax.f32 %v626_v60, %v629_v59 }
 0x350   : > { %v631_v63 = vsub.f32 %v626_v60, %v630_v61  ;;  %716 = vst.msk [vmem:[#allocation2] sm:$0xff] %vm648_vm5, %v630_v61  ;;  %636 = vperm.xlu1 %1375, %v630_v61   ;;  %v512_v61 = vld [vmem:[#allocation4] sm:$0xff] }
 0x352   : > { %v632_v29 = vmul.f32 1.442695, %v631_v63 }
 0x354   : > { %661 = vrot.lane.b32.xlu1 %v1250_v62, %s1437_s15 }
 0x355   : > { %v770_v1 = vpop.xlane.xlu0 %769  ;;  %1377 = vset.pattern.permute.xlu1 %v1442_v2 }
 0x357   : > { %v1600_v3 = vld [vmem:[#allocation2] sm:$0xff] }
 0x358   : > { %v1603_v4 = vmax.f32 %v1600_v3, %v770_v1 }
 0x35a   : > { %v772_v5 = vsub.f32 %v1600_v3, %v1603_v4  ;;  %854 = vst.msk [vmem:[#allocation2] sm:$0xff] %vm789_vm6, %v1603_v4  ;;  %777 = vperm.xlu0 %1376, %v1603_v4  }
 0x35c   : > { %v773_v45 = vmul.f32 1.442695, %v772_v5 }
 0x35d   : > { %v908_v6 = vpop.xlane.xlu1 %907 }
 0x35e   : > { %1379 = vset.pattern.permute.xlu0 %v1440_v51 }
 0x361   : > { %v1611_v7 = vld [vmem:[#allocation2] sm:$0xff] }
 0x362   : > { %v1614_v8 = vmax.f32 %v1611_v7, %v908_v6 }
 0x364   : > { %v910_v9 = vsub.f32 %v1611_v7, %v1614_v8  ;;  %992 = vst.msk [vmem:[#allocation2] sm:$0xff] %vm927_vm7, %v1614_v8  ;;  %915 = vperm.xlu1 %1377, %v1614_v8  }
 0x366   : > { %v911_v50 = vmul.f32 1.442695, %v910_v9 }
 0x368   : > { %799 = vrot.lane.b32.xlu1 %v1250_v62, %s1438_s16 }
 0x369   : > { %1378 = vset.pattern.permute.xlu1 %v1436_v12 }
 0x36c   : > { %937 = vrot.lane.b32.xlu1 %v1250_v62, %s1439_s17  ;;  %s420_s17 = scalar_lea.vmem %s1707_s7, %s1242_s9 }
 0x390   : > { %507 = vadd.xlane.f32.xlu1 %v506_v10 }
 0x3cb   : > { %v637_v11 = vpop.permute.xlu1 %636 }
 0x3cc   : > { %v639_v13 = vsub.f32 %v621_v40, %v637_v11 }
 0x3ce   : > { %v640_v14 = vmul.f32 1.442695, %v639_v13 }
 0x3cf   : > { %v662_v16 = vpop.permute.xlu1 %661 }
 0x3d0   : > { %1393 = vpow2.f32 %v640_v14  ;;  %v667_v19 = vsel %vm523_vm4, %v662_v16, 0 }
 0x3d1   : > { %1300 = vmatpush3.bf16.msra.mxu0 %v667_v19 }
 0x3d2   : > { %1311 = vmatprep.subr.bf16.mxu0 %v1433_v0 }
 0x3d5   : > { %v778_v20 = vpop.permute.xlu0 %777 }
 0x3d6   : > { %v780_v21 = vsub.f32 %v762_v46, %v778_v20 }
 0x3d8   : > { %v781_v22 = vmul.f32 1.442695, %v780_v21 }
 0x3da   : > { %1395 = vpow2.f32 %v781_v22  ;;  %v1390_v22 = vld [vmem:[%s1705_s5] sm:$0xff]  }
 0x3dd   : > { %v1394_v23 = vpop.eup %1393 }
 0x3de   : > { %v644_v24 = vsel %vm441_vm1, %v1394_v23, 0.0  ;;  %v657_v25 = vpack.c.bf16 %v1394_v23, %v1394_v23 }
 0x3df   : > { %645 = vadd.xlane.f32.xlu0 %v644_v24  ;;  %v916_v26 = vpop.permute.xlu1 %915 }
 0x3e0   : > { %v918_v27 = vsub.f32 %v900_v53, %v916_v26  ;;  %1302 = vmatmul.mubr.msk.bf16.vlgmr.msra.gmra.mxu0 %vm441_vm1, %v657_v25 }
 0x3e1   : > { %1313 = vmatprep.mubr.msk.bf16.mxu0 %vm1434_vm0, %v1433_v0 }
 0x3e2   : > { %v919_v28 = vmul.f32 1.442695, %v918_v27 }
 0x3e3   : > { %v800_v30 = vpop.permute.xlu1 %799 }
 0x3e4   : > { %1397 = vpow2.f32 %v919_v28  ;;  %v805_v31 = vsel %vm523_vm4, %v800_v30, 0 }
 0x3e5   : > { %1312 = vmatpush3.bf16.msra.mxu0 %v805_v31  ;;  %1399 = vpow2.f32 %v632_v29 }
 0x3e6   : > { %1323 = vmatprep.subr.bf16.mxu0 %v1433_v0  ;;  %1401 = vpow2.f32 %v494_v39 }
 0x3e7   : > { %v1396_v32 = vpop.eup %1395  ;;  %v938_v33 = vpop.permute.xlu1 %937  ;;  %1403 = vpow2.f32 %v773_v45 }
 0x3e8   : > { %v785_v34 = vsel %vm441_vm1, %v1396_v32, 0.0  ;;  %v798_v36 = vpack.c.bf16 %v1396_v32, %v1396_v32  ;;  %v943_v37 = vsel %vm523_vm4, %v938_v33, 0  ;;  %1405 = vpow2.f32 %v911_v50 }
 0x3e9   : > { %786 = vadd.xlane.f32.xlu1 %v785_v34 }
 0x3ea   : > { %1314 = vmatmul.mubr.msk.bf16.vlgmr.msra.gmra.mxu0 %vm441_vm1, %v798_v36 }
 0x3eb   : > { %1324 = vmatpush3.bf16.msra.mxu0 %v943_v37  ;;  %1325 = vmatprep.mubr.msk.bf16.mxu0 %vm1434_vm0, %v1433_v0 }
 0x3f1   : > { %v1398_v38 = vpop.eup %1397 }
 0x3f2   : > { %v923_v40 = vsel %vm441_vm1, %v1398_v38, 0.0  ;;  %v936_v41 = vpack.c.bf16 %v1398_v38, %v1398_v38  ;;  %v1400_v42 = vpop.eup %1399 }
 0x3f3   : > { %924 = vadd.xlane.f32.xlu1 %v923_v40  ;;  %v1402_v43 = vpop.eup %1401 }
 0x3f4   : > { %1326 = vmatmul.mubr.msk.bf16.vlgmr.msra.gmra.mxu0 %vm441_vm1, %v936_v41  ;;  %v505_v17 = vmul.f32 %v1402_v43, %v504_v15  ;;  %v1404_v52 = vpop.eup %1403 }
 0x3f5   : > { %653 = vperm.xlu0 %1379, %v1400_v42   ;;  %v1406_v59 = vpop.eup %1405 }
 0x3f9   : > { %1386 = vset.pattern.permute.xlu0 %v1442_v2 }
 0x404   : > { %515 = vperm.xlu1 %1378, %v1402_v43  }
 0x408   : > { %1380 = vset.pattern.permute.xlu1 %v1441_v58 }
 0x419   : > { %v508_v18 = vpop.xlane.xlu1 %507 }
 0x41a   : > { %v509_v44 = vadd.f32 %v508_v18, %v505_v17 }
 0x41c   : > { %511 = vst.msk [vmem:[#allocation3] sm:$0xff] %vm510_vm3, %v509_v44 }
 0x423   : > { %v642_v46 = vld [vmem:[#allocation3] sm:$0xff] }
 0x424   : > { %v643_v47 = vmul.f32 %v1400_v42, %v642_v46  ;;  %v1029_v46 = vld [vmem:[%s413_s12] sm:$0xff] }
 0x468   : > { %v646_v48 = vpop.xlane.xlu0 %645 }
 0x469   : > { %v647_v49 = vadd.f32 %v646_v48, %v643_v47  ;;  %v1256_v47 = vld [vmem:[%s1706_s6] ss:$0 sm:$0xff] }
 0x46a   : > { %v1037_v48 = vadd.f32 %v1256_v47, %v1029_v46 }
 0x46b   : > { %649 = vst.msk [vmem:[#allocation3] sm:$0xff] %vm648_vm5, %v647_v49 }
 0x470   : > { %v654_v23 = vpop.permute.xlu0 %653 }
 0x472   : > { %v783_v53 = vld [vmem:[#allocation3] sm:$0xff]  ;;  %v787_v55 = vpop.xlane.xlu1 %786 }
 0x473   : > { %v784_v54 = vmul.f32 %v1404_v52, %v783_v53 }
 0x475   : > { %v788_v56 = vadd.f32 %v787_v55, %v784_v54 }
 0x477   : > { %790 = vst.msk [vmem:[#allocation3] sm:$0xff] %vm789_vm6, %v788_v56 }
 0x47c   : > { %v925_v57 = vpop.xlane.xlu1 %924 }
 0x47e   : > { %v921_v60 = vld [vmem:[#allocation3] sm:$0xff] }
 0x47f   : > { %v922_v62 = vmul.f32 %v1406_v59, %v921_v60 }
 0x480   : > { %v516_v63 = vpop.permute.xlu1 %515 }
 0x481   : > { %v926_v1 = vadd.f32 %v925_v57, %v922_v62  ;;  %v518_v3 = vmul.f32 %v516_v63, %v512_v61 }
 0x483   : > { %928 = vst.msk [vmem:[#allocation3] sm:$0xff] %vm927_vm7, %v926_v1  ;;  %v567_v4 = vadd.f32 %v1585_v35, %v518_v3 }
 0x485   : > { %568 = vst.msk [vmem:[#allocation4] sm:$0xff] %vm441_vm1, %v567_v4 }
 0x48a   : > { %v996_v9 = vld [vmem:[#allocation3] sm:$0xff] }
 0x48b   : > { %1407 = vrcp.f32 %v996_v9 }
 0x498   : > { %v1408_v19 = vpop.eup %1407 }
 0x4a0   : > { %v703_v5 = vpop.f32.mrf.mxu0 }
 0x4a1   : > { %710 = vrot.lane.b32.xlu1 %v703_v5, %s1443_s21 }
 0x4a2   : > { %v1303_v6 = vpop.f32.mrf.mxu0 }
 0x4a4   : > { %v706_v7 = vpop.f32.mrf.mxu0 }
 0x4a5   : > { %794 = vperm.xlu1 %1380, %v1404_v52  }
 0x4a6   : > { %v1304_v8 = vpop.f32.mrf.mxu0 }
 0x4a9   : > { %1381 = vset.pattern.permute.xlu1 %v1442_v2 }
 0x4aa   : > { %v841_v10 = vpop.f32.mrf.mxu0 }
 0x4ab   : > { %848 = vrot.lane.b32.xlu1 %v841_v10, %s1444_s22 }
 0x4ac   : > { %v1315_v11 = vpop.f32.mrf.mxu0 }
 0x4ae   : > { %v844_v13 = vpop.f32.mrf.mxu0 }
 0x4af   : > { %932 = vperm.xlu1 %1381, %v1406_v59  }
 0x4b0   : > { %v1316_v35 = vpop.f32.mrf.mxu0 }
 0x4b3   : > { %1382 = vset.pattern.permute.xlu1 %v1436_v12  ;;  %v1389_v12 = vld [vmem:[%s1705_s5 + $0x8] sm:$0xff]  }
 0x4b4   : > { %v979_v14 = vpop.f32.mrf.mxu0  ;;  %1330 = vmatpush3.bf16.msra.mxu1 %v1389_v12 }
 0x4b5   : > { %986 = vrot.lane.b32.xlu1 %v979_v14, %s1445_s23  ;;  %1331 = vmatprep.subr.bf16.mxu1 %v1433_v0 }
 0x4b6   : > { %v1327_v16 = vpop.f32.mrf.mxu0 }
 0x4b8   : > { %v982_v20 = vpop.f32.mrf.mxu0  ;;  %1332 = vmatpush3.bf16.msra.mxu1 %v1390_v22 }
 0x4b9   : > { %1001 = vperm.xlu1 %1382, %v1408_v19  }
 0x4ba   : > { %v1328_v21 = vpop.f32.mrf.mxu0 }
 0x4bd   : > { %1383 = vset.pattern.permute.xlu1 %v1440_v51  ;;  %v650_v51 = vld [vmem:[#allocation4] sm:$0xff] }
 0x4be   : > { %1008 = vperm.xlu1 %1383, %v1408_v19   ;;  %v656_v24 = vmul.f32 %v654_v23, %v650_v51 }
 0x4c2   : > { %1384 = vset.pattern.permute.xlu1 %v1441_v58 }
 0x4c3   : > { %1015 = vperm.xlu1 %1384, %v1408_v19  }
 0x4c7   : > { %1385 = vset.pattern.permute.xlu1 %v1442_v2 }
 0x4c8   : > { %1022 = vperm.xlu1 %1385, %v1408_v19  }
 0x513   : > { %v711_v58 = vpop.permute.xlu1 %710 }
 0x514   : > { %v713_v25 = vadd.f32 %v711_v58, %v656_v24 }
 0x516   : > { %715 = vst.msk [vmem:[#allocation4] sm:$0xff] %vm714_vm9, %v713_v25 }
 0x51d   : > { %v791_v26 = vld [vmem:[#allocation4] sm:$0xff] }
 0x520   : > { %v795_v2 = vpop.permute.xlu1 %794 }
 0x521   : > { %v797_v27 = vmul.f32 %v795_v2, %v791_v26 }
 0x524   : > { %v849_v28 = vpop.permute.xlu1 %848 }
 0x525   : > { %v851_v29 = vadd.f32 %v849_v28, %v797_v27 }
 0x527   : > { %853 = vst.msk [vmem:[#allocation4] sm:$0xff] %vm852_vm10, %v851_v29 }
 0x52a   : > { %v933_v30 = vpop.permute.xlu1 %932 }
 0x52e   : > { %v929_v31 = vld [vmem:[#allocation4] sm:$0xff]  ;;  %v987_v32 = vpop.permute.xlu1 %986 }
 0x52f   : > { %v935_v0 = vmul.f32 %v933_v30, %v929_v31 }
 0x531   : > { %v989_v33 = vadd.f32 %v987_v32, %v935_v0 }
 0x533   : > { %991 = vst.msk [vmem:[#allocation4] sm:$0xff] %vm990_vm11, %v989_v33 }
 0x534   : > { %v1002_v36 = vpop.permute.xlu1 %1001 }
 0x539   : > { %v1009_v39 = vpop.permute.xlu1 %1008 }
 0x53a   : > { %v998_v34 = vld [vmem:[#allocation4] sm:$0xff] }
 0x53b   : > { %v1004_v37 = vmul.f32 %v1002_v36, %v998_v34 }
 0x53d   : > { %1005 = vst.msk [vmem:[#allocation4] sm:$0xff] %vm441_vm1, %v1004_v37 }
 0x53e   : > { %v1016_v42 = vpop.permute.xlu1 %1015 }
 0x543   : > { %v1023_v17 = vpop.permute.xlu1 %1022 }
 0x544   : > { %v1006_v38 = vld [vmem:[#allocation4] sm:$0xff] }
 0x545   : > { %v1011_v40 = vmul.f32 %v1009_v39, %v1006_v38 }
 0x547   : > { %1012 = vst.msk [vmem:[#allocation4] sm:$0xff] %vm714_vm9, %v1011_v40 }
 0x54e   : > { %v1013_v41 = vld [vmem:[#allocation4] sm:$0xff] }
 0x54f   : > { %v1018_v43 = vmul.f32 %v1016_v42, %v1013_v41 }
 0x551   : > { %1019 = vst.msk [vmem:[#allocation4] sm:$0xff] %vm852_vm10, %v1018_v43 }
 0x558   : > { %v1020_v15 = vld [vmem:[#allocation4] sm:$0xff] }
 0x559   : > { %v1025_v18 = vmul.f32 %v1023_v17, %v1020_v15 }
 0x55b   : > { %1026 = vst.msk [vmem:[#allocation4] sm:$0xff] %vm990_vm11, %v1025_v18 }
 0x562   : > { %v1027_v44 = vld [vmem:[#allocation4] sm:$0xff] }
 0x563   : > { %v1028_v45 = vpack.c.bf16 %v1027_v44, %v1027_v44 }
 0x565   : > { %1334 = vmatmul.mubr.msk.bf16.vlgmr.msra.gmra.mxu1 %vm429_vm8, %v1028_v45 }
 0x625   : > { %v1092_v49 = vpop.f32.mrf.mxu1 }
 0x626   : > { %v1098_v50 = vadd.f32 %v1092_v49, %v1037_v48 }
 0x627   : > { %v1335_v52 = vpop.f32.mrf.mxu1 }
 0x628   : > { %1099 = vst.msk [vmem:[%s420_s17] sm:$0xff] %vm429_vm8, %v1098_v50 }
 0x629   : > { %v1095_v53 = vpop.f32.mrf.mxu1 }
 0x62b   : > { %v1336_v54 = vpop.f32.mrf.mxu1 }
 0x62c PF: > { %s17_s26 = sadd.s32 1, %s1431_s26   ;;  %s1708_s24 = smov %s1427_s25 }
 0x62d   : > { %p14_p5 = scmp.ge.s32.totalorder %s17_s26, 4   ;;  %s1709_s25 = smov %s1711_s27 }
 0x62f   :  { %16 = sbr.rel (!%p14_p5) target bundleno = 2 (0x2), region = 98 }

// kernel: transformer_seg_forward.11
= control target key start
LH: loop header
LB: loop body
LE: loop exit
PB: predicated region body
PF: predicated region fallthrough
CT: control target
= control target key end

     0   :  { %vm35_vm0 = vcmask 261120   ;;  %v353_v15 = vmov 0.0   ;;  %vm354_vm1 = vmmov 0   ;;  %vm101_vm6 = vcmask 257024   ;;  %s468_s0 = inlined_call_operand.vmem [shape: f32[16,32], index: 0, kind: input, shape index: {}, may-alias: {0,7}]   ;;  %s469_s3 = inlined_call_operand.vmem [shape: bf16[32,64], index: 3, kind: input, shape index: {}]   ;;  %s470_s5 = inlined_call_operand.vmem [shape: bf16[64,32], index: 5, kind: input, shape index: {}]   ;;  %s471_s1 = inlined_call_operand.vmem [shape: f32[1,32], index: 1, kind: input, shape index: {}]   ;;  %s472_s2 = inlined_call_operand.vmem [shape: f32[1,32], index: 2, kind: input, shape index: {}]   ;;  %s473_s4 = inlined_call_operand.vmem [shape: f32[1,64], index: 4, kind: input, shape index: {}]   ;;  %s474_s6 = inlined_call_operand.vmem [shape: f32[1,32], index: 6, kind: input, shape index: {}]   ;;  %s475_s7 = inlined_call_operand.vmem [shape: f32[16,32], index: 7, kind: output, shape index: {}, may-alias: {0,7}]  }
   0x1   :  { %v398_v0 = vld [vmem:[%s468_s0] sm:$0xff]  ;;  %v403_v1 = vld [vmem:[%s468_s0 + $0x8] sm:$0xff]  ;;  %316 = vmatprep.subr.bf16.mxu0 %v353_v15  ;;  %104 = vst.msk [vmem:[#allocation3] sm:$0xff] %vm35_vm0, %v353_v15  ;;  %105 = vst.msk [vmem:[#allocation3 + $0x8] sm:$0xff] %vm35_vm0, %v353_v15  ;;  %324 = vmatprep.subr.bf16.mxu1 %v353_v15  ;;  %vm218_vm7 = vcmask 523264  }
   0x2   :  { %v36_v2 = vsel %vm35_vm0, %v398_v0, 0.0  ;;  %v39_v3 = vsel %vm35_vm0, %v403_v1, 0.0  ;;  %v338_v14 = vld [vmem:[%s469_s3 + $0x8] sm:$0xff]   ;;  %v339_v16 = vld [vmem:[%s469_s3] sm:$0xff]   ;;  %320 = vmatprep.mubr.msk.bf16.mxu0 %vm354_vm1, %v353_v15  ;;  %332 = vmatprep.mubr.msk.bf16.mxu1 %vm354_vm1, %v353_v15  ;;  %v341_v17 = vld [vmem:[%s470_s5 + $0x18] sm:$0xff]  }
   0x3   :  { %37 = vadd.xlane.f32.xlu0 %v36_v2  ;;  %317 = vmatpush3.bf16.msra.mxu0 %v338_v14  ;;  %v291_v34 = vld [vmem:[%s471_s1] ss:$0 sm:$0xff]  ;;  %v342_v47 = vld [vmem:[%s470_s5 + $0x10] sm:$0xff]   ;;  %v343_v48 = vld [vmem:[%s470_s5 + $0x8] sm:$0xff]  }
   0x4   :  { %318 = vmatprep.subr.bf16.mxu0 %v353_v15  ;;  %325 = vmatpush3.bf16.msra.mxu1 %v341_v17  ;;  %v292_v37 = vld [vmem:[%s472_s2] ss:$0 sm:$0xff] }
   0x5   :  { %326 = vmatprep.subr.bf16.mxu1 %v353_v15  ;;  %v344_v49 = vld [vmem:[%s470_s5] sm:$0xff]  }
   0x6   :  { %v295_v50 = vld [vmem:[%s473_s4] ss:$0 sm:$0xff] }
   0x7   :  { %40 = vadd.xlane.f32.xlu0 %v39_v3  ;;  %319 = vmatpush3.bf16.msra.mxu0 %v339_v16 }
   0x8   :  { %327 = vmatpush3.bf16.msra.mxu1 %v342_v47  ;;  %v184_v60 = vld [vmem:[#allocation3] sm:$0xff]  ;;  %v185_v2 = vld [vmem:[#allocation3 + $0x8] sm:$0xff] }
   0x9   :  { %328 = vmatprep.subr.bf16.mxu1 %v353_v15 }
   0xc   :  { %329 = vmatpush3.bf16.msra.mxu1 %v343_v48 }
   0xd   :  { %330 = vmatprep.subr.bf16.mxu1 %v353_v15 }
  0x10   :  { %331 = vmatpush3.bf16.msra.mxu1 %v344_v49 }
  0x8c   :  { %v38_v4 = vpop.xlane.xlu0 %37 }
  0x8d   :  { %v43_v5 = vmul.f32 0.03125, %v38_v4 }
  0x8f   :  { %v45_v6 = vsub.f32 %v398_v0, %v43_v5 }
  0x90   :  { %v41_v7 = vpop.xlane.xlu0 %40 }
  0x91   :  { %v44_v8 = vmul.f32 0.03125, %v41_v7  ;;  %v47_v9 = vmul.f32 %v45_v6, %v45_v6  ;;  %v63_v35 = vmul.f32 %v291_v34, %v45_v6  ;;  %v305_v7 = vld [vmem:[%s474_s6] ss:$0 sm:$0xff] }
  0x93   :  { %v46_v10 = vsub.f32 %v403_v1, %v44_v8  ;;  %v49_v11 = vsel %vm35_vm0, %v47_v9, 0.0 }
  0x94   :  { %50 = vadd.xlane.f32.xlu1 %v49_v11 }
  0x95   :  { %v48_v12 = vmul.f32 %v46_v10, %v46_v10  ;;  %v64_v39 = vmul.f32 %v291_v34, %v46_v10 }
  0x97   :  { %v52_v13 = vsel %vm35_vm0, %v48_v12, 0.0 }
  0x98   :  { %53 = vadd.xlane.f32.xlu1 %v52_v13 }
 0x11d   :  { %v51_v18 = vpop.xlane.xlu1 %50 }
 0x11e   :  { %v55_v19 = vmul.f32 0.032258064, %v51_v18 }
 0x120   :  { %345 = vrsqrt.f32 %v55_v19  ;;  %vm67_vm2 = vcmp.eq.f32.partialorder %v55_v19, inf  ;;  %v70_v24 = vand.u32 2147483648, %v55_v19  ;;  %vm69_vm3 = vcmp.eq.f32.partialorder %v55_v19, 0.0 }
 0x121   :  { %v54_v20 = vpop.xlane.xlu1 %53 }
 0x122   :  { %v56_v21 = vmul.f32 0.032258064, %v54_v20 }
 0x124   :  { %347 = vrsqrt.f32 %v56_v21  ;;  %vm74_vm4 = vcmp.eq.f32.partialorder %v56_v21, inf  ;;  %v77_v30 = vand.u32 2147483648, %v56_v21  ;;  %vm76_vm5 = vcmp.eq.f32.partialorder %v56_v21, 0.0 }
 0x12d   :  { %v346_v22 = vpop.eup %345 }
 0x12e   :  { %v66_v23 = vmul.f32 %v346_v22, %v55_v19 }
 0x130   :  { %v68_v25 = vsel %vm67_vm2, %v55_v19, %v66_v23 }
 0x131   :  { %v348_v26 = vpop.eup %347  ;;  %v71_v27 = vsel %vm69_vm3, %v70_v24, %v68_v25 }
 0x132   :  { %v79_v28 = vadd.f32 1e-06, %v71_v27  ;;  %v73_v29 = vmul.f32 %v348_v26, %v56_v21 }
 0x134   :  { %349 = vrcp.f32 %v79_v28  ;;  %v75_v31 = vsel %vm74_vm4, %v56_v21, %v73_v29 }
 0x135   :  { %v78_v32 = vsel %vm76_vm5, %v77_v30, %v75_v31 }
 0x136   :  { %v80_v33 = vadd.f32 1e-06, %v78_v32 }
 0x138   :  { %351 = vrcp.f32 %v80_v33 }
 0x141   :  { %v350_v36 = vpop.eup %349 }
 0x142   :  { %v82_v38 = vmul.f32 %v350_v36, %v63_v35 }
 0x144   :  { %v91_v40 = vadd.f32 %v292_v37, %v82_v38 }
 0x145   :  { %v352_v41 = vpop.eup %351 }
 0x146   :  { %v306_v42 = vpack.c.bf16 %v91_v40, %v91_v40  ;;  %v84_v43 = vmul.f32 %v352_v41, %v64_v39 }
 0x148   :  { %102 = vst.msk [vmem:[#allocation2] sm:$0xf] %vm101_vm6, %v306_v42  ;;  %v92_v44 = vadd.f32 %v292_v37, %v84_v43 }
 0x14a   :  { %v307_v45 = vpack.c.bf16 %v92_v44, %v92_v44 }
 0x14c   :  { %103 = vst.msk [vmem:[#allocation2 + $0x4] sm:$0xf] %vm101_vm6, %v307_v45 }
 0x153   :  { %v340_v46 = vld [vmem:[#allocation2] sm:$0xff]  }
 0x154   :  { %321 = vmatmul.mubr.msk.bf16.vlgmr.msra.gmra.mxu0 %vm35_vm0, %v340_v46 }
 0x214   :  { %v174_v51 = vpop.f32.mrf.mxu0 }
 0x215   :  { %v175_v53 = vadd.f32 %v295_v50, %v174_v51 }
 0x216   :  { %v322_v52 = vpop.f32.mrf.mxu0 }
 0x217   :  { %v181_v57 = vmax.f32 %v175_v53, 0.0 }
 0x218   :  { %v177_v54 = vpop.f32.mrf.mxu0 }
 0x219   :  { %v178_v55 = vadd.f32 %v295_v50, %v177_v54 }
 0x21a   :  { %v323_v56 = vpop.f32.mrf.mxu0 }
 0x21b   :  { %v182_v58 = vmax.f32 %v178_v55, 0.0 }
 0x21d   :  { %v183_v59 = vpack.c.bf16 %v182_v58, %v181_v57 }
 0x21f   :  { %333 = vmatmul.mubr.msk.bf16.vlgmr.msra.gmra.mxu1 %vm218_vm7, %v183_v59 }
 0x2df   :  { %v256_v61 = vpop.f32.mrf.mxu1 }
 0x2e0   :  { %v263_v62 = vadd.f32 %v256_v61, %v184_v60 }
 0x2e1   :  { %v334_v63 = vpop.f32.mrf.mxu1 }
 0x2e2   :  { %265 = vst.msk [vmem:[#allocation3] sm:$0xff] %vm35_vm0, %v263_v62 }
 0x2e3   :  { %v259_v3 = vpop.f32.mrf.mxu1 }
 0x2e4   :  { %v264_v4 = vadd.f32 %v259_v3, %v185_v2 }
 0x2e5   :  { %v335_v5 = vpop.f32.mrf.mxu1 }
 0x2e6   :  { %266 = vst.msk [vmem:[#allocation3 + $0x8] sm:$0xff] %vm35_vm0, %v264_v4 }
 0x2e9   :  { %v272_v6 = vld [vmem:[#allocation3] sm:$0xff] }
 0x2ea   :  { %v274_v8 = vadd.f32 %v272_v6, %v398_v0 }
 0x2ec   :  { %v283_v9 = vadd.f32 %v305_v7, %v274_v8 }
 0x2ed   :  { %v273_v10 = vld [vmem:[#allocation3 + $0x8] sm:$0xff] }
 0x2ee   :  { %285 = vst.msk [vmem:[%s475_s7] sm:$0xff] %vm35_vm0, %v283_v9  ;;  %v275_v11 = vadd.f32 %v273_v10, %v403_v1 }
 0x2f0   :  { %v284_v12 = vadd.f32 %v305_v7, %v275_v11 }
 0x2f2   :  { %286 = vst.msk [vmem:[%s475_s7 + $0x8] sm:$0xff] %vm35_vm0, %v284_v12 }

// kernel: transformer_seg_forward.15
= control target key start
LH: loop header
LB: loop body
LE: loop exit
PB: predicated region body
PF: predicated region fallthrough
CT: control target
= control target key end

     0   :  { %vm25_vm0 = vcmask 261120   ;;  %v186_v14 = vmov 0.0   ;;  %vm187_vm1 = vmmov 0   ;;  %s250_s0 = inlined_call_operand.vmem [shape: f32[16,32], index: 0, kind: input, shape index: {}]   ;;  %s251_s3 = inlined_call_operand.vmem [shape: bf16[32,128], index: 3, kind: input, shape index: {}]   ;;  %s252_s1 = inlined_call_operand.vmem [shape: f32[1,32], index: 1, kind: input, shape index: {}]   ;;  %s253_s2 = inlined_call_operand.vmem [shape: f32[1,32], index: 2, kind: input, shape index: {}]   ;;  %s254_s4 = inlined_call_operand.vmem [shape: f32[1,128], index: 4, kind: input, shape index: {}]   ;;  %s255_s5 = inlined_call_operand.vmem [shape: f32[16,128], index: 5, kind: output, shape index: {}]  }
   0x1   :  { %v21_v0 = vld [vmem:[%s250_s0] sm:$0xff]  ;;  %v22_v1 = vld [vmem:[%s250_s0 + $0x8] sm:$0xff]  ;;  %166 = vmatprep.subr.bf16.mxu0 %v186_v14  ;;  %170 = vmatprep.mubr.msk.bf16.mxu0 %vm187_vm1, %v186_v14 }
   0x2   :  { %v26_v2 = vsel %vm25_vm0, %v21_v0, 0.0  ;;  %v29_v3 = vsel %vm25_vm0, %v22_v1, 0.0  ;;  %v176_v15 = vld [vmem:[%s251_s3 + $0x8] sm:$0xff]   ;;  %v177_v16 = vld [vmem:[%s251_s3] sm:$0xff]  }
   0x3   :  { %27 = vadd.xlane.f32.xlu0 %v26_v2  ;;  %167 = vmatpush3.bf16.msra.mxu0 %v176_v15  ;;  %v157_v33 = vld [vmem:[%s252_s1] ss:$0 sm:$0xff] }
   0x4   :  { %168 = vmatprep.subr.bf16.mxu0 %v186_v14  ;;  %v158_v39 = vld [vmem:[%s253_s2] ss:$0 sm:$0xff] }
   0x5   :  { %v159_v44 = vld [vmem:[%s254_s4] ss:$0 sm:$0xff] }
   0x7   :  { %30 = vadd.xlane.f32.xlu0 %v29_v3  ;;  %169 = vmatpush3.bf16.msra.mxu0 %v177_v16 }
  0x8c   :  { %v28_v4 = vpop.xlane.xlu0 %27 }
  0x8d   :  { %v33_v5 = vmul.f32 0.03125, %v28_v4 }
  0x8f   :  { %v35_v6 = vsub.f32 %v21_v0, %v33_v5 }
  0x90   :  { %v31_v7 = vpop.xlane.xlu0 %30 }
  0x91   :  { %v34_v8 = vmul.f32 0.03125, %v31_v7  ;;  %v37_v9 = vmul.f32 %v35_v6, %v35_v6  ;;  %v53_v35 = vmul.f32 %v157_v33, %v35_v6 }
  0x93   :  { %v36_v10 = vsub.f32 %v22_v1, %v34_v8  ;;  %v39_v11 = vsel %vm25_vm0, %v37_v9, 0.0 }
  0x94   :  { %40 = vadd.xlane.f32.xlu1 %v39_v11 }
  0x95   :  { %v38_v12 = vmul.f32 %v36_v10, %v36_v10  ;;  %v54_v36 = vmul.f32 %v157_v33, %v36_v10 }
  0x97   :  { %v42_v13 = vsel %vm25_vm0, %v38_v12, 0.0 }
  0x98   :  { %43 = vadd.xlane.f32.xlu1 %v42_v13 }
 0x11d   :  { %v41_v17 = vpop.xlane.xlu1 %40 }
 0x11e   :  { %v45_v18 = vmul.f32 0.032258064, %v41_v17 }
 0x120   :  { %178 = vrsqrt.f32 %v45_v18  ;;  %vm57_vm2 = vcmp.eq.f32.partialorder %v45_v18, inf  ;;  %v60_v23 = vand.u32 2147483648, %v45_v18  ;;  %vm59_vm3 = vcmp.eq.f32.partialorder %v45_v18, 0.0 }
 0x121   :  { %v44_v19 = vpop.xlane.xlu1 %43 }
 0x122   :  { %v46_v20 = vmul.f32 0.032258064, %v44_v19 }
 0x124   :  { %180 = vrsqrt.f32 %v46_v20  ;;  %vm64_vm4 = vcmp.eq.f32.partialorder %v46_v20, inf  ;;  %v67_v29 = vand.u32 2147483648, %v46_v20  ;;  %vm66_vm5 = vcmp.eq.f32.partialorder %v46_v20, 0.0 }
 0x12d   :  { %v179_v21 = vpop.eup %178 }
 0x12e   :  { %v56_v22 = vmul.f32 %v179_v21, %v45_v18 }
 0x130   :  { %v58_v24 = vsel %vm57_vm2, %v45_v18, %v56_v22 }
 0x131   :  { %v181_v25 = vpop.eup %180  ;;  %v61_v26 = vsel %vm59_vm3, %v60_v23, %v58_v24 }
 0x132   :  { %v69_v27 = vadd.f32 1e-06, %v61_v26  ;;  %v63_v28 = vmul.f32 %v181_v25, %v46_v20 }
 0x134   :  { %182 = vrcp.f32 %v69_v27  ;;  %v65_v30 = vsel %vm64_vm4, %v46_v20, %v63_v28 }
 0x135   :  { %v68_v31 = vsel %vm66_vm5, %v67_v29, %v65_v30 }
 0x136   :  { %v70_v32 = vadd.f32 1e-06, %v68_v31 }
 0x138   :  { %184 = vrcp.f32 %v70_v32 }
 0x141   :  { %v183_v34 = vpop.eup %182 }
 0x142   :  { %v72_v37 = vmul.f32 %v183_v34, %v53_v35 }
 0x144   :  { %v81_v41 = vadd.f32 %v158_v39, %v72_v37 }
 0x145   :  { %v185_v38 = vpop.eup %184 }
 0x146   :  { %v74_v40 = vmul.f32 %v185_v38, %v54_v36 }
 0x148   :  { %v82_v42 = vadd.f32 %v158_v39, %v74_v40 }
 0x14a   :  { %v83_v43 = vpack.c.bf16 %v82_v42, %v81_v41 }
 0x14c   :  { %171 = vmatmul.mubr.msk.bf16.vlgmr.msra.gmra.mxu0 %vm25_vm0, %v83_v43 }
 0x20c   :  { %v144_v45 = vpop.f32.mrf.mxu0 }
 0x20d   :  { %v145_v46 = vadd.f32 %v159_v44, %v144_v45 }
 0x20e   :  { %v172_v47 = vpop.f32.mrf.mxu0 }
 0x20f   :  { %151 = vst [vmem:[%s255_s5] sm:$0xff] %v145_v46 }
 0x210   :  { %v147_v48 = vpop.f32.mrf.mxu0 }
 0x211   :  { %v148_v49 = vadd.f32 %v159_v44, %v147_v48 }
 0x212   :  { %v173_v50 = vpop.f32.mrf.mxu0 }
 0x213   :  { %152 = vst [vmem:[%s255_s5 + $0x8] sm:$0xff] %v148_v49 }

</bundles_post_ra>
